<compile_context>
chip_gen: v7x
topology: tpu7x:2x2x1
jax: 0.10.0
libtpu: 0.0.40
codegen_flags: <defaults>
</compile_context>

<pallas_src>
import functools

import jax
import jax.numpy as jnp
import numpy as np
from jax import lax
from jax.experimental import pallas as pl
from jax.experimental.pallas import tpu as pltpu


def _round_up(x, m):
    return (x + m - 1) // m * m


def _detect_num_tc():
    """2 on dual-TensorCore chips (v7x), else 1. Both paths are correct on any chip."""
    try:
        kind = jax.devices()[0].device_kind.lower()
    except Exception:
        return 1
    return 2 if ("v7" in kind or "7x" in kind) else 1


_NUM_TC = _detect_num_tc()


# ------------------------------------------------------------------
# Pallas kernels
# ------------------------------------------------------------------

def _gemm_bias_relu_kernel(a_ref, w_ref, b_ref, o_ref):
    acc = jnp.dot(a_ref[...], w_ref[...], preferred_element_type=jnp.float32)
    o_ref[...] = jnp.maximum(acc + b_ref[...], 0.0).astype(o_ref.dtype)


def pallas_conv_gemm_relu(cols, w, bias, *, num_m_blocks=1):
    """(M,K)@(K,N)+bias, ReLU. bf16 operands/output, f32 accumulation/bias.
    N zero-padded to 128 lanes, K padded to bf16 sublane packing (16).
    M is split across a parallel grid axis only when num_m_blocks > 1 (v7x dual TC)."""
    M, K = cols.shape
    N = w.shape[1]
    Np = _round_up(N, 128)
    Kp = _round_up(K, 16)
    Mp = _round_up(M, 8 * num_m_blocks)
    tm = Mp // num_m_blocks

    a = jnp.pad(cols, ((0, Mp - M), (0, Kp - K))).astype(jnp.bfloat16)
    wp = jnp.pad(w, ((0, Kp - K), (0, Np - N))).astype(jnp.bfloat16)
    bp = jnp.pad(bias, (0, Np - N)).astype(jnp.float32).reshape(1, Np)

    out = pl.pallas_call(
        _gemm_bias_relu_kernel,
        out_shape=jax.ShapeDtypeStruct((Mp, Np), jnp.bfloat16),
        grid=(num_m_blocks,),
        in_specs=[
            pl.BlockSpec((tm, Kp), lambda i: (i, 0)),
            pl.BlockSpec((Kp, Np), lambda i: (0, 0)),
            pl.BlockSpec((1, Np), lambda i: (0, 0)),
        ],
        out_specs=pl.BlockSpec((tm, Np), lambda i: (i, 0)),
        compiler_params=pltpu.CompilerParams(
            dimension_semantics=("parallel",) if num_m_blocks > 1 else ("arbitrary",)),
    )(a, wp, bp)
    return out[:M]


def _fused_seq_kernel(cols_ref, w2_ref, b2_ref, wih_ref, bih_ref,
                      whh_ref, bhh_ref, lw_ref, lb_ref, o_ref, *, T, B, H, Ho):
    """conv2 GEMM + ReLU + H-mean + fused-gate bidirectional GRU + linear + softmax.

    cols_ref : (Ho*T*B, K2p)  conv2 im2col rows ordered (Ho, Wo=T, B), bf16
    w2_ref   : (K2p, Cp)      folded-BN conv2 weight, bf16
    b2_ref   : (1, Cp)        folded-BN conv2 bias, f32
    wih_ref  : (Cp, GP)       fused input projection [r_f z_f n_f r_b z_b n_b | pad], bf16
    bih_ref  : (1, GP)        fused input bias, f32
    whh_ref  : (2H, GP)       block-diagonal fused recurrent weight (fwd rows / bwd rows), bf16
    bhh_ref  : (1, GP)        fused recurrent bias, f32
    lw_ref   : (2H, NclsP)    linear weight (rows = [h_f ; h_b]), bf16
    lb_ref   : (1, NclsP)     linear bias, pad lanes = -1e9, f32
    o_ref    : (T*B, NclsP)   softmax probabilities, f32
    """
    rows = T * B

    # ---- conv2 + bias + ReLU, then features_to_sequence H-mean (tile-aligned row blocks)
    acc = jnp.dot(cols_ref[...], w2_ref[...], preferred_element_type=jnp.float32)
    acc = jnp.maximum(acc + b2_ref[...], 0.0)                 # (Ho*T*B, Cp)
    feat = acc[0:rows]
    for h in range(1, Ho):
        feat = feat + acc[h * rows:(h + 1) * rows]
    feat = feat * (1.0 / Ho)                                  # (T*B, Cp) time-major

    # ---- fused input projections: ONE lane-dense GEMM for both directions & all gates
    gx = jnp.dot(feat.astype(jnp.bfloat16), wih_ref[...],
                 preferred_element_type=jnp.float32) + bih_ref[...]   # (T*B, GP)

    whh = whh_ref[...]                                        # (2H, GP) bf16, hoisted
    bhh = bhh_ref[...]                                        # (1, GP) f32, hoisted

    h_f = jnp.zeros((B, H), jnp.float32)                      # init_hidden == zeros
    h_b = jnp.zeros((B, H), jnp.float32)
    hs_f = [None] * T
    hs_b = [None] * T
    for t in range(T):                                        # statically unrolled (T known)
        tb = T - 1 - t                                        # backward dir reversed in-kernel
        hcat = jnp.concatenate([h_f, h_b], axis=1).astype(jnp.bfloat16)   # (B, 2H)
        # ONE block-diagonal recurrent matmul per step (both dirs, all gates)
        g = jnp.dot(hcat, whh, preferred_element_type=jnp.float32) + bhh  # (B, GP)
        gxf = gx[t * B:(t + 1) * B]
        gxb = gx[tb * B:(tb + 1) * B]
        # forward direction (gate cols [0,3H))
        r_f = jax.nn.sigmoid(gxf[:, 0:H] + g[:, 0:H])
        z_f = jax.nn.sigmoid(gxf[:, H:2 * H] + g[:, H:2 * H])
        n_f = jnp.tanh(gxf[:, 2 * H:3 * H] + r_f * g[:, 2 * H:3 * H])    # r * (W_hn h + b_hn)
        h_f = (1.0 - z_f) * n_f + z_f * h_f
        # backward direction (gate cols [3H,6H))
        r_b = jax.nn.sigmoid(gxb[:, 3 * H:4 * H] + g[:, 3 * H:4 * H])
        z_b = jax.nn.sigmoid(gxb[:, 4 * H:5 * H] + g[:, 4 * H:5 * H])
        n_b = jnp.tanh(gxb[:, 5 * H:6 * H] + r_b * g[:, 5 * H:6 * H])
        h_b = (1.0 - z_b) * n_b + z_b * h_b
        hs_f[t] = h_f
        hs_b[tb] = h_b

    # ---- stack hidden states ONCE into a dense (T*B, 2H) slab (no per-step masked stores)
    h_all = jnp.concatenate(
        [jnp.concatenate([hs_f[t], hs_b[t]], axis=1) for t in range(T)], axis=0)

    # ---- single head GEMM + softmax (lane-dense padded class dim)
    logits = (jnp.dot(h_all.astype(jnp.bfloat16), lw_ref[...],
                      preferred_element_type=jnp.float32) + lb_ref[...])
    m = jnp.max(logits, axis=-1, keepdims=True)
    e = jnp.exp(logits - m)
    s = jnp.sum(e, axis=-1, keepdims=True)
    o_ref[...] = e * pl.reciprocal(s, approx=True)


def pack_seq_weights_fused(params, hidden, c_feat, cp, gp, np_cls):
    """Pack GRU / linear weights into the fused layouts the sequence kernel expects."""
    H = hidden
    # fused input projection: columns [r_f, z_f, n_f, r_b, z_b, n_b, pad]
    wih = jnp.zeros((cp, gp), jnp.float32)
    wih = wih.at[:c_feat, 0:3 * H].set(params["w_ih_f"].T)
    wih = wih.at[:c_feat, 3 * H:6 * H].set(params["w_ih_b"].T)
    bih = jnp.zeros((1, gp), jnp.float32)
    bih = bih.at[0, 0:3 * H].set(params["b_ih_f"])
    bih = bih.at[0, 3 * H:6 * H].set(params["b_ih_b"])
    # block-diagonal fused recurrent weight: rows [h_f ; h_b]
    whh = jnp.zeros((2 * H, gp), jnp.float32)
    whh = whh.at[0:H, 0:3 * H].set(params["w_hh_f"].T)
    whh = whh.at[H:2 * H, 3 * H:6 * H].set(params["w_hh_b"].T)
    bhh = jnp.zeros((1, gp), jnp.float32)
    bhh = bhh.at[0, 0:3 * H].set(params["b_hh_f"])
    bhh = bhh.at[0, 3 * H:6 * H].set(params["b_hh_b"])
    # linear head: rows [h_f ; h_b] (PyTorch bi-GRU output concat order), padded classes
    ncls = params["lin_b"].shape[0]
    lw = jnp.zeros((2 * H, np_cls), jnp.float32)
    lw = lw.at[:, :ncls].set(params["lin_w"].T)
    lb = jnp.full((1, np_cls), -1e9, jnp.float32)              # finite pad -> softmax ~ 0
    lb = lb.at[0, :ncls].set(params["lin_b"])
    return (wih.astype(jnp.bfloat16), bih, whh.astype(jnp.bfloat16), bhh,
            lw.astype(jnp.bfloat16), lb)


def pallas_seq_stage(cols2, w2, b2, params, *, T, B, Ho):
    """One fused pallas_call: conv2 GEMM + H-mean + biGRU + linear + softmax."""
    hidden = params["w_hh_f"].shape[1]
    c_feat = params["w_ih_f"].shape[1]
    ncls = params["lin_b"].shape[0]
    np_cls = _round_up(ncls, 128)
    gp = _round_up(6 * hidden, 128)
    cp = _round_up(w2.shape[1], 128)

    M2, K2 = cols2.shape
    K2p = _round_up(K2, 16)                                    # bf16 sublane packing
    a = jnp.pad(cols2.astype(jnp.bfloat16), ((0, 0), (0, K2p - K2)))
    w2p = jnp.pad(w2, ((0, K2p - K2), (0, cp - w2.shape[1]))).astype(jnp.bfloat16)
    b2p = jnp.pad(b2, (0, cp - b2.shape[0])).astype(jnp.float32).reshape(1, cp)

    wih, bih, whh, bhh, lw, lb = pack_seq_weights_fused(
        params, hidden, c_feat, cp, gp, np_cls)

    out = pl.pallas_call(
        functools.partial(_fused_seq_kernel, T=T, B=B, H=hidden, Ho=Ho),
        out_shape=jax.ShapeDtypeStruct((T * B, np_cls), jnp.float32),
        grid=(1,),
        in_specs=[
            pl.BlockSpec((M2, K2p), lambda i: (0, 0)),
            pl.BlockSpec((K2p, cp), lambda i: (0, 0)),
            pl.BlockSpec((1, cp), lambda i: (0, 0)),
            pl.BlockSpec((cp, gp), lambda i: (0, 0)),
            pl.BlockSpec((1, gp), lambda i: (0, 0)),
            pl.BlockSpec((2 * hidden, gp), lambda i: (0, 0)),
            pl.BlockSpec((1, gp), lambda i: (0, 0)),
            pl.BlockSpec((2 * hidden, np_cls), lambda i: (0, 0)),
            pl.BlockSpec((1, np_cls), lambda i: (0, 0)),
        ],
        out_specs=pl.BlockSpec((T * B, np_cls), lambda i: (0, 0)),
    )(a, w2p, b2p, wih, bih, whh, bhh, lw, lb)
    return out.reshape(T, B, np_cls)[:, :, :ncls]


# ------------------------------------------------------------------
# Plain-JAX glue (im2col, BN folding, pooling, parameter setup)
# ------------------------------------------------------------------

def im2col_nhwc(x, kh, kw, stride, pad, row_order="bhw"):
    """NHWC -> (rows, C*kh*kw); column order (C, kh, kw) matches PyTorch weight reshape.
    row_order picks how (B, Ho, Wo) are flattened into GEMM rows."""
    # TODO(synk): patch extraction / window gathering kept as plain-JAX glue.
    B, H, W, C = x.shape
    xp = jnp.pad(x, ((0, 0), (pad, pad), (pad, pad), (0, 0)))
    Ho = (H + 2 * pad - kh) // stride + 1
    Wo = (W + 2 * pad - kw) // stride + 1
    patches = []
    for i in range(kh):
        for j in range(kw):
            patches.append(xp[:, i:i + Ho * stride:stride, j:j + Wo * stride:stride, :])
    cols = jnp.stack(patches, axis=0).reshape(kh, kw, B, Ho, Wo, C)
    axes = {"b": 2, "h": 3, "w": 4}
    perm = tuple(axes[a] for a in row_order) + (5, 0, 1)       # (..., C, kh, kw)
    cols = jnp.transpose(cols, perm)
    rows = int(np.prod(cols.shape[:3]))
    return cols.reshape(rows, C * kh * kw), Ho, Wo


def fold_bn_into_gemm(conv_w, bn, eps=1e-5):
    """Eval-mode BatchNorm folded into the conv GEMM weight/bias (f32; cast later)."""
    scale = bn["gamma"] / jnp.sqrt(bn["var"] + eps)
    cout = conv_w.shape[0]
    w = (conv_w * scale[:, None, None, None]).reshape(cout, -1).T  # (Cin*kh*kw, Cout)
    b = bn["beta"] - bn["mean"] * scale
    return w, b


def init_params(key, in_ch=3, c1=8, c_feat=32, hidden=32, num_classes=10):
    ks = jax.random.split(key, 24)

    def u(k, shape, scale):
        return jax.random.uniform(k, shape, jnp.float32, -scale, scale)

    def bn(k0, k1, k2, k3, c):
        return {
            "gamma": 1.0 + 0.1 * jax.random.normal(k0, (c,), jnp.float32),
            "beta": 0.05 * jax.random.normal(k1, (c,), jnp.float32),
            "mean": 0.01 * jax.random.normal(k2, (c,), jnp.float32),
            "var": jnp.abs(1.0 + 0.1 * jax.random.normal(k3, (c,), jnp.float32)),
        }

    kh = 1.0 / np.sqrt(hidden)
    return {
        "conv1_w": u(ks[0], (c1, in_ch, 7, 7), 1.0 / np.sqrt(in_ch * 49)),
        "bn1": bn(ks[1], ks[2], ks[3], ks[4], c1),
        "conv2_w": u(ks[5], (c_feat, c1, 3, 3), 1.0 / np.sqrt(c1 * 9)),
        "bn2": bn(ks[6], ks[7], ks[8], ks[9], c_feat),
        # bidirectional GRU, gate order (r, z, n), PyTorch shapes
        "w_ih_f": u(ks[10], (3 * hidden, c_feat), kh),
        "w_hh_f": u(ks[11], (3 * hidden, hidden), kh),
        "b_ih_f": u(ks[12], (3 * hidden,), kh),
        "b_hh_f": u(ks[13], (3 * hidden,), kh),
        "w_ih_b": u(ks[14], (3 * hidden, c_feat), kh),
        "w_hh_b": u(ks[15], (3 * hidden, hidden), kh),
        "b_ih_b": u(ks[16], (3 * hidden,), kh),
        "b_hh_b": u(ks[17], (3 * hidden,), kh),
        "lin_w": u(ks[18], (num_classes + 1, 2 * hidden), 1.0 / np.sqrt(2 * hidden)),
        "lin_b": u(ks[19], (num_classes + 1,), 1.0 / np.sqrt(2 * hidden)),
    }


@jax.jit
def crnn_forward(x, params):
    B = x.shape[0]
    c1 = params["conv1_w"].shape[0]

    # single NCHW -> NHWC conversion; stay NHWC (channels on the lane axis) afterwards.
    x_nhwc = jnp.transpose(x, (0, 2, 3, 1))

    # ---- conv1 + bn1 + relu (lane-dense bf16 GEMM; M-tiled across TCs only on v7x) ----
    w1, b1 = fold_bn_into_gemm(params["conv1_w"], params["bn1"])
    cols1, Ho1, Wo1 = im2col_nhwc(x_nhwc, 7, 7, stride=2, pad=3, row_order="bhw")
    y = pallas_conv_gemm_relu(cols1, w1, b1, num_m_blocks=_NUM_TC)   # (B*Ho1*Wo1, 128) bf16
    y = y.reshape(B, Ho1, Wo1, -1)                 # keep the 128 padded channels (zeros)

    # ---- maxpool 3x3 stride 2 pad 1 (NHWC, stays on the 128-padded lane-dense layout) ----
    # TODO(synk): window max-pool kept as lax.reduce_window glue.
    y = lax.reduce_window(
        y, jnp.array(-jnp.inf, y.dtype), lax.max,
        (1, 3, 3, 1), (1, 2, 2, 1), [(0, 0), (1, 1), (1, 1), (0, 0)])

    # ---- conv2 im2col (pad channels sliced away only here, keeping K small) ----
    w2, b2 = fold_bn_into_gemm(params["conv2_w"], params["bn2"])
    cols2, Ho2, Wo2 = im2col_nhwc(y[..., :c1], 3, 3, stride=1, pad=1, row_order="hwb")

    # ---- ONE fused kernel: conv2 + H-mean + fused-gate biGRU + linear + softmax ----
    return pallas_seq_stage(cols2, w2, b2, params, T=Wo2, B=B, Ho=Ho2)  # (T, B, ncls+1)


if __name__ == "__main__":
    key = jax.random.PRNGKey(0)
    pkey, xkey = jax.random.split(key)
    params = init_params(pkey, in_ch=3, c1=8, c_feat=32, hidden=32, num_classes=10)
    x = jax.random.normal(xkey, (2, 3, 16, 32), jnp.float32)   # NCHW input

    out = crnn_forward(x, params)
    out = jax.block_until_ready(out)

    assert out.shape == (8, 2, 11), out.shape                  # (T, B, num_classes + 1)
    sums = np.asarray(jnp.sum(out, axis=-1))
    assert np.allclose(sums, 1.0, atol=1e-2)                   # softmax rows sum to ~1
    assert np.isfinite(np.asarray(out)).all()
    print("KERNEL_OK")
</pallas_src>

<mosaic_0001>
module attributes {stable_mosaic.version = 11 : i64} {
  func.func @_gemm_bias_relu_kernel(%arg0: i32, %arg1: memref<256x160xbf16, #tpu.memory_space<vmem>>, %arg2: memref<160x128xbf16, #tpu.memory_space<vmem>>, %arg3: memref<1x128xf32, #tpu.memory_space<vmem>>, %arg4: memref<256x128xbf16, #tpu.memory_space<vmem>>) attributes {dimension_semantics = [#tpu.dimension_semantics<arbitrary>], iteration_bounds = array<i64: 1>, scalar_prefetch = 0 : i64, scratch_operands = 0 : i64, tpu.core_type = #tpu.core_type<tc>, window_params = [{transform_indices = @transform_0, window_bounds = array<i64: 256, 160>}, {pipeline_mode = #tpu.pipeline_mode<synchronous>, transform_indices = @transform_1, window_bounds = array<i64: 160, 128>}, {pipeline_mode = #tpu.pipeline_mode<synchronous>, transform_indices = @transform_2, window_bounds = array<i64: 1, 128>}, {transform_indices = @transform_3, window_bounds = array<i64: 256, 128>}]} {
    %c0 = arith.constant 0 : index
    %c0_0 = arith.constant 0 : index
    %0 = vector.load %arg1[%c0, %c0_0] : memref<256x160xbf16, #tpu.memory_space<vmem>>, vector<256x160xbf16>
    %c0_1 = arith.constant 0 : index
    %c0_2 = arith.constant 0 : index
    %1 = vector.load %arg2[%c0_1, %c0_2] : memref<160x128xbf16, #tpu.memory_space<vmem>>, vector<160x128xbf16>
    %cst = arith.constant dense<0.000000e+00> : vector<256x128xf32>
    %2 = tpu.matmul %0, %1, %cst {dimension_numbers = #tpu.dot_dimension_numbers<[1], [0], [0], [1], [0, 0, 1, 1], [], []>} : vector<256x160xbf16>, vector<160x128xbf16>, vector<256x128xf32> -> vector<256x128xf32>
    %c0_3 = arith.constant 0 : index
    %c0_4 = arith.constant 0 : index
    %3 = vector.load %arg3[%c0_3, %c0_4] : memref<1x128xf32, #tpu.memory_space<vmem>>, vector<1x128xf32>
    %4 = vector.broadcast %3 : vector<1x128xf32> to vector<256x128xf32>
    %5 = arith.addf %2, %4 : vector<256x128xf32>
    %cst_5 = arith.constant 0.000000e+00 : f32
    %6 = vector.broadcast %cst_5 : f32 to vector<256x128xf32>
    %7 = arith.maximumf %5, %6 : vector<256x128xf32>
    %8 = arith.truncf %7 : vector<256x128xf32> to vector<256x128xbf16>
    %c0_6 = arith.constant 0 : index
    %c0_7 = arith.constant 0 : index
    %9 = vector.load %arg4[%c0_6, %c0_7] : memref<256x128xbf16, #tpu.memory_space<vmem>>, vector<256x128xbf16>
    tpu.vector_store %arg4[%c0_6, %c0_7], %8 {strides = array<i32>} : memref<256x128xbf16, #tpu.memory_space<vmem>>, vector<256x128xbf16>,
    return
  }
  func.func @transform_0(%arg0: i32) -> (i32, i32) {
    %c0_i32 = arith.constant 0 : i32
    %c0_i32_0 = arith.constant 0 : i32
    return %arg0, %c0_i32 : i32, i32
  }
  func.func @transform_1(%arg0: i32) -> (i32, i32) {
    %c0_i32 = arith.constant 0 : i32
    %c0_i32_0 = arith.constant 0 : i32
    %c0_i32_1 = arith.constant 0 : i32
    return %c0_i32, %c0_i32_0 : i32, i32
  }
  func.func @transform_2(%arg0: i32) -> (i32, i32) {
    %c0_i32 = arith.constant 0 : i32
    %c0_i32_0 = arith.constant 0 : i32
    %c0_i32_1 = arith.constant 0 : i32
    return %c0_i32, %c0_i32_0 : i32, i32
  }
  func.func @transform_3(%arg0: i32) -> (i32, i32) {
    %c0_i32 = arith.constant 0 : i32
    %c0_i32_0 = arith.constant 0 : i32
    return %arg0, %c0_i32 : i32, i32
  }
}

module attributes {stable_mosaic.version = 11 : i64} {
  func.func @_fused_seq_kernel(%arg0: i32, %arg1: memref<64x80xbf16, #tpu.memory_space<vmem>>, %arg2: memref<80x128xbf16, #tpu.memory_space<vmem>>, %arg3: memref<1x128xf32, #tpu.memory_space<vmem>>, %arg4: memref<128x256xbf16, #tpu.memory_space<vmem>>, %arg5: memref<1x256xf32, #tpu.memory_space<vmem>>, %arg6: memref<64x256xbf16, #tpu.memory_space<vmem>>, %arg7: memref<1x256xf32, #tpu.memory_space<vmem>>, %arg8: memref<64x128xbf16, #tpu.memory_space<vmem>>, %arg9: memref<1x128xf32, #tpu.memory_space<vmem>>, %arg10: memref<16x128xf32, #tpu.memory_space<vmem>>) attributes {dimension_semantics = [#tpu.dimension_semantics<arbitrary>], iteration_bounds = array<i64: 1>, scalar_prefetch = 0 : i64, scratch_operands = 0 : i64, tpu.core_type = #tpu.core_type<tc>, window_params = [{pipeline_mode = #tpu.pipeline_mode<synchronous>, transform_indices = @transform_0, window_bounds = array<i64: 64, 80>}, {pipeline_mode = #tpu.pipeline_mode<synchronous>, transform_indices = @transform_1, window_bounds = array<i64: 80, 128>}, {pipeline_mode = #tpu.pipeline_mode<synchronous>, transform_indices = @transform_2, window_bounds = array<i64: 1, 128>}, {pipeline_mode = #tpu.pipeline_mode<synchronous>, transform_indices = @transform_3, window_bounds = array<i64: 128, 256>}, {pipeline_mode = #tpu.pipeline_mode<synchronous>, transform_indices = @transform_4, window_bounds = array<i64: 1, 256>}, {pipeline_mode = #tpu.pipeline_mode<synchronous>, transform_indices = @transform_5, window_bounds = array<i64: 64, 256>}, {pipeline_mode = #tpu.pipeline_mode<synchronous>, transform_indices = @transform_6, window_bounds = array<i64: 1, 256>}, {pipeline_mode = #tpu.pipeline_mode<synchronous>, transform_indices = @transform_7, window_bounds = array<i64: 64, 128>}, {pipeline_mode = #tpu.pipeline_mode<synchronous>, transform_indices = @transform_8, window_bounds = array<i64: 1, 128>}, {pipeline_mode = #tpu.pipeline_mode<synchronous>, transform_indices = @transform_9, window_bounds = array<i64: 16, 128>}]} {
    %c0 = arith.constant 0 : index
    %c0_0 = arith.constant 0 : index
    %0 = vector.load %arg1[%c0, %c0_0] : memref<64x80xbf16, #tpu.memory_space<vmem>>, vector<64x80xbf16>
    %c0_1 = arith.constant 0 : index
    %c0_2 = arith.constant 0 : index
    %1 = vector.load %arg2[%c0_1, %c0_2] : memref<80x128xbf16, #tpu.memory_space<vmem>>, vector<80x128xbf16>
    %cst = arith.constant dense<0.000000e+00> : vector<64x128xf32>
    %2 = tpu.matmul %0, %1, %cst {dimension_numbers = #tpu.dot_dimension_numbers<[1], [0], [0], [1], [0, 0, 1, 1], [], []>} : vector<64x80xbf16>, vector<80x128xbf16>, vector<64x128xf32> -> vector<64x128xf32>
    %c0_3 = arith.constant 0 : index
    %c0_4 = arith.constant 0 : index
    %3 = vector.load %arg3[%c0_3, %c0_4] : memref<1x128xf32, #tpu.memory_space<vmem>>, vector<1x128xf32>
    %4 = vector.broadcast %3 : vector<1x128xf32> to vector<64x128xf32>
    %5 = arith.addf %2, %4 : vector<64x128xf32>
    %cst_5 = arith.constant 0.000000e+00 : f32
    %6 = vector.broadcast %cst_5 : f32 to vector<64x128xf32>
    %7 = arith.maximumf %5, %6 : vector<64x128xf32>
    %8 = vector.extract_strided_slice %7 {offsets = [0, 0], sizes = [16, 128], strides = [1, 1]} : vector<64x128xf32> to vector<16x128xf32>
    %9 = vector.extract_strided_slice %7 {offsets = [16, 0], sizes = [16, 128], strides = [1, 1]} : vector<64x128xf32> to vector<16x128xf32>
    %10 = arith.addf %8, %9 : vector<16x128xf32>
    %11 = vector.extract_strided_slice %7 {offsets = [32, 0], sizes = [16, 128], strides = [1, 1]} : vector<64x128xf32> to vector<16x128xf32>
    %12 = arith.addf %10, %11 : vector<16x128xf32>
    %13 = vector.extract_strided_slice %7 {offsets = [48, 0], sizes = [16, 128], strides = [1, 1]} : vector<64x128xf32> to vector<16x128xf32>
    %14 = arith.addf %12, %13 : vector<16x128xf32>
    %cst_6 = arith.constant 2.500000e-01 : f32
    %15 = vector.broadcast %cst_6 : f32 to vector<16x128xf32>
    %16 = arith.mulf %14, %15 : vector<16x128xf32>
    %17 = arith.truncf %16 : vector<16x128xf32> to vector<16x128xbf16>
    %c0_7 = arith.constant 0 : index
    %c0_8 = arith.constant 0 : index
    %18 = vector.load %arg4[%c0_7, %c0_8] : memref<128x256xbf16, #tpu.memory_space<vmem>>, vector<128x256xbf16>
    %cst_9 = arith.constant dense<0.000000e+00> : vector<16x256xf32>
    %19 = tpu.matmul %17, %18, %cst_9 {dimension_numbers = #tpu.dot_dimension_numbers<[1], [0], [0], [1], [0, 0, 1, 1], [], []>} : vector<16x128xbf16>, vector<128x256xbf16>, vector<16x256xf32> -> vector<16x256xf32>
    %c0_10 = arith.constant 0 : index
    %c0_11 = arith.constant 0 : index
    %20 = vector.load %arg5[%c0_10, %c0_11] : memref<1x256xf32, #tpu.memory_space<vmem>>, vector<1x256xf32>
    %21 = vector.broadcast %20 : vector<1x256xf32> to vector<16x256xf32>
    %22 = arith.addf %19, %21 : vector<16x256xf32>
    %c0_12 = arith.constant 0 : index
    %c0_13 = arith.constant 0 : index
    %23 = vector.load %arg6[%c0_12, %c0_13] : memref<64x256xbf16, #tpu.memory_space<vmem>>, vector<64x256xbf16>
    %c0_14 = arith.constant 0 : index
    %c0_15 = arith.constant 0 : index
    %24 = vector.load %arg7[%c0_14, %c0_15] : memref<1x256xf32, #tpu.memory_space<vmem>>, vector<1x256xf32>
    %cst_16 = arith.constant 0.000000e+00 : f32
    %25 = vector.broadcast %cst_16 : f32 to vector<2x32xf32>
    %cst_17 = arith.constant 0.000000e+00 : f32
    %26 = vector.broadcast %cst_17 : f32 to vector<2x32xf32>
    %27 = tpu.concatenate %25, %26 in 1 : vector<2x32xf32>, vector<2x32xf32> -> vector<2x64xf32>
    %28 = arith.truncf %27 : vector<2x64xf32> to vector<2x64xbf16>
    %cst_18 = arith.constant dense<0.000000e+00> : vector<2x256xf32>
    %29 = tpu.matmul %28, %23, %cst_18 {dimension_numbers = #tpu.dot_dimension_numbers<[1], [0], [0], [1], [0, 0, 1, 1], [], []>} : vector<2x64xbf16>, vector<64x256xbf16>, vector<2x256xf32> -> vector<2x256xf32>
    %30 = vector.broadcast %24 : vector<1x256xf32> to vector<2x256xf32>
    %31 = arith.addf %29, %30 : vector<2x256xf32>
    %32 = vector.extract_strided_slice %22 {offsets = [0, 0], sizes = [2, 256], strides = [1, 1]} : vector<16x256xf32> to vector<2x256xf32>
    %33 = vector.extract_strided_slice %22 {offsets = [14, 0], sizes = [2, 256], strides = [1, 1]} : vector<16x256xf32> to vector<2x256xf32>
    %34 = vector.extract_strided_slice %32 {offsets = [0, 0], sizes = [2, 32], strides = [1, 1]} : vector<2x256xf32> to vector<2x32xf32>
    %35 = vector.extract_strided_slice %31 {offsets = [0, 0], sizes = [2, 32], strides = [1, 1]} : vector<2x256xf32> to vector<2x32xf32>
    %36 = arith.addf %34, %35 : vector<2x32xf32>
    %37 = arith.negf %36 : vector<2x32xf32>
    %38 = math.exp %37 : vector<2x32xf32>
    %cst_19 = arith.constant 1.000000e+00 : f32
    %39 = vector.broadcast %cst_19 : f32 to vector<2x32xf32>
    %40 = arith.addf %39, %38 : vector<2x32xf32>
    %41 = arith.divf %39, %40 : vector<2x32xf32>
    %42 = vector.extract_strided_slice %32 {offsets = [0, 32], sizes = [2, 32], strides = [1, 1]} : vector<2x256xf32> to vector<2x32xf32>
    %43 = vector.extract_strided_slice %31 {offsets = [0, 32], sizes = [2, 32], strides = [1, 1]} : vector<2x256xf32> to vector<2x32xf32>
    %44 = arith.addf %42, %43 : vector<2x32xf32>
    %45 = arith.negf %44 : vector<2x32xf32>
    %46 = math.exp %45 : vector<2x32xf32>
    %cst_20 = arith.constant 1.000000e+00 : f32
    %47 = vector.broadcast %cst_20 : f32 to vector<2x32xf32>
    %48 = arith.addf %47, %46 : vector<2x32xf32>
    %49 = arith.divf %47, %48 : vector<2x32xf32>
    %50 = vector.extract_strided_slice %32 {offsets = [0, 64], sizes = [2, 32], strides = [1, 1]} : vector<2x256xf32> to vector<2x32xf32>
    %51 = vector.extract_strided_slice %31 {offsets = [0, 64], sizes = [2, 32], strides = [1, 1]} : vector<2x256xf32> to vector<2x32xf32>
    %52 = arith.mulf %41, %51 : vector<2x32xf32>
    %53 = arith.addf %50, %52 : vector<2x32xf32>
    %54 = math.tanh %53 : vector<2x32xf32>
    %cst_21 = arith.constant 1.000000e+00 : f32
    %55 = vector.broadcast %cst_21 : f32 to vector<2x32xf32>
    %56 = arith.subf %55, %49 : vector<2x32xf32>
    %57 = arith.mulf %56, %54 : vector<2x32xf32>
    %58 = arith.mulf %49, %25 : vector<2x32xf32>
    %59 = arith.addf %57, %58 : vector<2x32xf32>
    %60 = vector.extract_strided_slice %33 {offsets = [0, 96], sizes = [2, 32], strides = [1, 1]} : vector<2x256xf32> to vector<2x32xf32>
    %61 = vector.extract_strided_slice %31 {offsets = [0, 96], sizes = [2, 32], strides = [1, 1]} : vector<2x256xf32> to vector<2x32xf32>
    %62 = arith.addf %60, %61 : vector<2x32xf32>
    %63 = arith.negf %62 : vector<2x32xf32>
    %64 = math.exp %63 : vector<2x32xf32>
    %cst_22 = arith.constant 1.000000e+00 : f32
    %65 = vector.broadcast %cst_22 : f32 to vector<2x32xf32>
    %66 = arith.addf %65, %64 : vector<2x32xf32>
    %67 = arith.divf %65, %66 : vector<2x32xf32>
    %68 = vector.extract_strided_slice %33 {offsets = [0, 128], sizes = [2, 32], strides = [1, 1]} : vector<2x256xf32> to vector<2x32xf32>
    %69 = vector.extract_strided_slice %31 {offsets = [0, 128], sizes = [2, 32], strides = [1, 1]} : vector<2x256xf32> to vector<2x32xf32>
    %70 = arith.addf %68, %69 : vector<2x32xf32>
    %71 = arith.negf %70 : vector<2x32xf32>
    %72 = math.exp %71 : vector<2x32xf32>
    %cst_23 = arith.constant 1.000000e+00 : f32
    %73 = vector.broadcast %cst_23 : f32 to vector<2x32xf32>
    %74 = arith.addf %73, %72 : vector<2x32xf32>
    %75 = arith.divf %73, %74 : vector<2x32xf32>
    %76 = vector.extract_strided_slice %33 {offsets = [0, 160], sizes = [2, 32], strides = [1, 1]} : vector<2x256xf32> to vector<2x32xf32>
    %77 = vector.extract_strided_slice %31 {offsets = [0, 160], sizes = [2, 32], strides = [1, 1]} : vector<2x256xf32> to vector<2x32xf32>
    %78 = arith.mulf %67, %77 : vector<2x32xf32>
    %79 = arith.addf %76, %78 : vector<2x32xf32>
    %80 = math.tanh %79 : vector<2x32xf32>
    %cst_24 = arith.constant 1.000000e+00 : f32
    %81 = vector.broadcast %cst_24 : f32 to vector<2x32xf32>
    %82 = arith.subf %81, %75 : vector<2x32xf32>
    %83 = arith.mulf %82, %80 : vector<2x32xf32>
    %84 = arith.mulf %75, %26 : vector<2x32xf32>
    %85 = arith.addf %83, %84 : vector<2x32xf32>
    %86 = tpu.concatenate %59, %85 in 1 : vector<2x32xf32>, vector<2x32xf32> -> vector<2x64xf32>
    %87 = arith.truncf %86 : vector<2x64xf32> to vector<2x64xbf16>
    %cst_25 = arith.constant dense<0.000000e+00> : vector<2x256xf32>
    %88 = tpu.matmul %87, %23, %cst_25 {dimension_numbers = #tpu.dot_dimension_numbers<[1], [0], [0], [1], [0, 0, 1, 1], [], []>} : vector<2x64xbf16>, vector<64x256xbf16>, vector<2x256xf32> -> vector<2x256xf32>
    %89 = vector.broadcast %24 : vector<1x256xf32> to vector<2x256xf32>
    %90 = arith.addf %88, %89 : vector<2x256xf32>
    %91 = vector.extract_strided_slice %22 {offsets = [2, 0], sizes = [2, 256], strides = [1, 1]} : vector<16x256xf32> to vector<2x256xf32>
    %92 = vector.extract_strided_slice %22 {offsets = [12, 0], sizes = [2, 256], strides = [1, 1]} : vector<16x256xf32> to vector<2x256xf32>
    %93 = vector.extract_strided_slice %91 {offsets = [0, 0], sizes = [2, 32], strides = [1, 1]} : vector<2x256xf32> to vector<2x32xf32>
    %94 = vector.extract_strided_slice %90 {offsets = [0, 0], sizes = [2, 32], strides = [1, 1]} : vector<2x256xf32> to vector<2x32xf32>
    %95 = arith.addf %93, %94 : vector<2x32xf32>
    %96 = arith.negf %95 : vector<2x32xf32>
    %97 = math.exp %96 : vector<2x32xf32>
    %cst_26 = arith.constant 1.000000e+00 : f32
    %98 = vector.broadcast %cst_26 : f32 to vector<2x32xf32>
    %99 = arith.addf %98, %97 : vector<2x32xf32>
    %100 = arith.divf %98, %99 : vector<2x32xf32>
    %101 = vector.extract_strided_slice %91 {offsets = [0, 32], sizes = [2, 32], strides = [1, 1]} : vector<2x256xf32> to vector<2x32xf32>
    %102 = vector.extract_strided_slice %90 {offsets = [0, 32], sizes = [2, 32], strides = [1, 1]} : vector<2x256xf32> to vector<2x32xf32>
    %103 = arith.addf %101, %102 : vector<2x32xf32>
    %104 = arith.negf %103 : vector<2x32xf32>
    %105 = math.exp %104 : vector<2x32xf32>
    %cst_27 = arith.constant 1.000000e+00 : f32
    %106 = vector.broadcast %cst_27 : f32 to vector<2x32xf32>
    %107 = arith.addf %106, %105 : vector<2x32xf32>
    %108 = arith.divf %106, %107 : vector<2x32xf32>
    %109 = vector.extract_strided_slice %91 {offsets = [0, 64], sizes = [2, 32], strides = [1, 1]} : vector<2x256xf32> to vector<2x32xf32>
    %110 = vector.extract_strided_slice %90 {offsets = [0, 64], sizes = [2, 32], strides = [1, 1]} : vector<2x256xf32> to vector<2x32xf32>
    %111 = arith.mulf %100, %110 : vector<2x32xf32>
    %112 = arith.addf %109, %111 : vector<2x32xf32>
    %113 = math.tanh %112 : vector<2x32xf32>
    %cst_28 = arith.constant 1.000000e+00 : f32
    %114 = vector.broadcast %cst_28 : f32 to vector<2x32xf32>
    %115 = arith.subf %114, %108 : vector<2x32xf32>
    %116 = arith.mulf %115, %113 : vector<2x32xf32>
    %117 = arith.mulf %108, %59 : vector<2x32xf32>
    %118 = arith.addf %116, %117 : vector<2x32xf32>
    %119 = vector.extract_strided_slice %92 {offsets = [0, 96], sizes = [2, 32], strides = [1, 1]} : vector<2x256xf32> to vector<2x32xf32>
    %120 = vector.extract_strided_slice %90 {offsets = [0, 96], sizes = [2, 32], strides = [1, 1]} : vector<2x256xf32> to vector<2x32xf32>
    %121 = arith.addf %119, %120 : vector<2x32xf32>
    %122 = arith.negf %121 : vector<2x32xf32>
    %123 = math.exp %122 : vector<2x32xf32>
    %cst_29 = arith.constant 1.000000e+00 : f32
    %124 = vector.broadcast %cst_29 : f32 to vector<2x32xf32>
    %125 = arith.addf %124, %123 : vector<2x32xf32>
    %126 = arith.divf %124, %125 : vector<2x32xf32>
    %127 = vector.extract_strided_slice %92 {offsets = [0, 128], sizes = [2, 32], strides = [1, 1]} : vector<2x256xf32> to vector<2x32xf32>
    %128 = vector.extract_strided_slice %90 {offsets = [0, 128], sizes = [2, 32], strides = [1, 1]} : vector<2x256xf32> to vector<2x32xf32>
    %129 = arith.addf %127, %128 : vector<2x32xf32>
    %130 = arith.negf %129 : vector<2x32xf32>
    %131 = math.exp %130 : vector<2x32xf32>
    %cst_30 = arith.constant 1.000000e+00 : f32
    %132 = vector.broadcast %cst_30 : f32 to vector<2x32xf32>
    %133 = arith.addf %132, %131 : vector<2x32xf32>
    %134 = arith.divf %132, %133 : vector<2x32xf32>
    %135 = vector.extract_strided_slice %92 {offsets = [0, 160], sizes = [2, 32], strides = [1, 1]} : vector<2x256xf32> to vector<2x32xf32>
    %136 = vector.extract_strided_slice %90 {offsets = [0, 160], sizes = [2, 32], strides = [1, 1]} : vector<2x256xf32> to vector<2x32xf32>
    %137 = arith.mulf %126, %136 : vector<2x32xf32>
    %138 = arith.addf %135, %137 : vector<2x32xf32>
    %139 = math.tanh %138 : vector<2x32xf32>
    %cst_31 = arith.constant 1.000000e+00 : f32
    %140 = vector.broadcast %cst_31 : f32 to vector<2x32xf32>
    %141 = arith.subf %140, %134 : vector<2x32xf32>
    %142 = arith.mulf %141, %139 : vector<2x32xf32>
    %143 = arith.mulf %134, %85 : vector<2x32xf32>
    %144 = arith.addf %142, %143 : vector<2x32xf32>
    %145 = tpu.concatenate %118, %144 in 1 : vector<2x32xf32>, vector<2x32xf32> -> vector<2x64xf32>
    %146 = arith.truncf %145 : vector<2x64xf32> to vector<2x64xbf16>
    %cst_32 = arith.constant dense<0.000000e+00> : vector<2x256xf32>
    %147 = tpu.matmul %146, %23, %cst_32 {dimension_numbers = #tpu.dot_dimension_numbers<[1], [0], [0], [1], [0, 0, 1, 1], [], []>} : vector<2x64xbf16>, vector<64x256xbf16>, vector<2x256xf32> -> vector<2x256xf32>
    %148 = vector.broadcast %24 : vector<1x256xf32> to vector<2x256xf32>
    %149 = arith.addf %147, %148 : vector<2x256xf32>
    %150 = vector.extract_strided_slice %22 {offsets = [4, 0], sizes = [2, 256], strides = [1, 1]} : vector<16x256xf32> to vector<2x256xf32>
    %151 = vector.extract_strided_slice %22 {offsets = [10, 0], sizes = [2, 256], strides = [1, 1]} : vector<16x256xf32> to vector<2x256xf32>
    %152 = vector.extract_strided_slice %150 {offsets = [0, 0], sizes = [2, 32], strides = [1, 1]} : vector<2x256xf32> to vector<2x32xf32>
    %153 = vector.extract_strided_slice %149 {offsets = [0, 0], sizes = [2, 32], strides = [1, 1]} : vector<2x256xf32> to vector<2x32xf32>
    %154 = arith.addf %152, %153 : vector<2x32xf32>
    %155 = arith.negf %154 : vector<2x32xf32>
    %156 = math.exp %155 : vector<2x32xf32>
    %cst_33 = arith.constant 1.000000e+00 : f32
    %157 = vector.broadcast %cst_33 : f32 to vector<2x32xf32>
    %158 = arith.addf %157, %156 : vector<2x32xf32>
    %159 = arith.divf %157, %158 : vector<2x32xf32>
    %160 = vector.extract_strided_slice %150 {offsets = [0, 32], sizes = [2, 32], strides = [1, 1]} : vector<2x256xf32> to vector<2x32xf32>
    %161 = vector.extract_strided_slice %149 {offsets = [0, 32], sizes = [2, 32], strides = [1, 1]} : vector<2x256xf32> to vector<2x32xf32>
    %162 = arith.addf %160, %161 : vector<2x32xf32>
    %163 = arith.negf %162 : vector<2x32xf32>
    %164 = math.exp %163 : vector<2x32xf32>
    %cst_34 = arith.constant 1.000000e+00 : f32
    %165 = vector.broadcast %cst_34 : f32 to vector<2x32xf32>
    %166 = arith.addf %165, %164 : vector<2x32xf32>
    %167 = arith.divf %165, %166 : vector<2x32xf32>
    %168 = vector.extract_strided_slice %150 {offsets = [0, 64], sizes = [2, 32], strides = [1, 1]} : vector<2x256xf32> to vector<2x32xf32>
    %169 = vector.extract_strided_slice %149 {offsets = [0, 64], sizes = [2, 32], strides = [1, 1]} : vector<2x256xf32> to vector<2x32xf32>
    %170 = arith.mulf %159, %169 : vector<2x32xf32>
    %171 = arith.addf %168, %170 : vector<2x32xf32>
    %172 = math.tanh %171 : vector<2x32xf32>
    %cst_35 = arith.constant 1.000000e+00 : f32
    %173 = vector.broadcast %cst_35 : f32 to vector<2x32xf32>
    %174 = arith.subf %173, %167 : vector<2x32xf32>
    %175 = arith.mulf %174, %172 : vector<2x32xf32>
    %176 = arith.mulf %167, %118 : vector<2x32xf32>
    %177 = arith.addf %175, %176 : vector<2x32xf32>
    %178 = vector.extract_strided_slice %151 {offsets = [0, 96], sizes = [2, 32], strides = [1, 1]} : vector<2x256xf32> to vector<2x32xf32>
    %179 = vector.extract_strided_slice %149 {offsets = [0, 96], sizes = [2, 32], strides = [1, 1]} : vector<2x256xf32> to vector<2x32xf32>
    %180 = arith.addf %178, %179 : vector<2x32xf32>
    %181 = arith.negf %180 : vector<2x32xf32>
    %182 = math.exp %181 : vector<2x32xf32>
    %cst_36 = arith.constant 1.000000e+00 : f32
    %183 = vector.broadcast %cst_36 : f32 to vector<2x32xf32>
    %184 = arith.addf %183, %182 : vector<2x32xf32>
    %185 = arith.divf %183, %184 : vector<2x32xf32>
    %186 = vector.extract_strided_slice %151 {offsets = [0, 128], sizes = [2, 32], strides = [1, 1]} : vector<2x256xf32> to vector<2x32xf32>
    %187 = vector.extract_strided_slice %149 {offsets = [0, 128], sizes = [2, 32], strides = [1, 1]} : vector<2x256xf32> to vector<2x32xf32>
    %188 = arith.addf %186, %187 : vector<2x32xf32>
    %189 = arith.negf %188 : vector<2x32xf32>
    %190 = math.exp %189 : vector<2x32xf32>
    %cst_37 = arith.constant 1.000000e+00 : f32
    %191 = vector.broadcast %cst_37 : f32 to vector<2x32xf32>
    %192 = arith.addf %191, %190 : vector<2x32xf32>
    %193 = arith.divf %191, %192 : vector<2x32xf32>
    %194 = vector.extract_strided_slice %151 {offsets = [0, 160], sizes = [2, 32], strides = [1, 1]} : vector<2x256xf32> to vector<2x32xf32>
    %195 = vector.extract_strided_slice %149 {offsets = [0, 160], sizes = [2, 32], strides = [1, 1]} : vector<2x256xf32> to vector<2x32xf32>
    %196 = arith.mulf %185, %195 : vector<2x32xf32>
    %197 = arith.addf %194, %196 : vector<2x32xf32>
    %198 = math.tanh %197 : vector<2x32xf32>
    %cst_38 = arith.constant 1.000000e+00 : f32
    %199 = vector.broadcast %cst_38 : f32 to vector<2x32xf32>
    %200 = arith.subf %199, %193 : vector<2x32xf32>
    %201 = arith.mulf %200, %198 : vector<2x32xf32>
    %202 = arith.mulf %193, %144 : vector<2x32xf32>
    %203 = arith.addf %201, %202 : vector<2x32xf32>
    %204 = tpu.concatenate %177, %203 in 1 : vector<2x32xf32>, vector<2x32xf32> -> vector<2x64xf32>
    %205 = arith.truncf %204 : vector<2x64xf32> to vector<2x64xbf16>
    %cst_39 = arith.constant dense<0.000000e+00> : vector<2x256xf32>
    %206 = tpu.matmul %205, %23, %cst_39 {dimension_numbers = #tpu.dot_dimension_numbers<[1], [0], [0], [1], [0, 0, 1, 1], [], []>} : vector<2x64xbf16>, vector<64x256xbf16>, vector<2x256xf32> -> vector<2x256xf32>
    %207 = vector.broadcast %24 : vector<1x256xf32> to vector<2x256xf32>
    %208 = arith.addf %206, %207 : vector<2x256xf32>
    %209 = vector.extract_strided_slice %22 {offsets = [6, 0], sizes = [2, 256], strides = [1, 1]} : vector<16x256xf32> to vector<2x256xf32>
    %210 = vector.extract_strided_slice %22 {offsets = [8, 0], sizes = [2, 256], strides = [1, 1]} : vector<16x256xf32> to vector<2x256xf32>
    %211 = vector.extract_strided_slice %209 {offsets = [0, 0], sizes = [2, 32], strides = [1, 1]} : vector<2x256xf32> to vector<2x32xf32>
    %212 = vector.extract_strided_slice %208 {offsets = [0, 0], sizes = [2, 32], strides = [1, 1]} : vector<2x256xf32> to vector<2x32xf32>
    %213 = arith.addf %211, %212 : vector<2x32xf32>
    %214 = arith.negf %213 : vector<2x32xf32>
    %215 = math.exp %214 : vector<2x32xf32>
    %cst_40 = arith.constant 1.000000e+00 : f32
    %216 = vector.broadcast %cst_40 : f32 to vector<2x32xf32>
    %217 = arith.addf %216, %215 : vector<2x32xf32>
    %218 = arith.divf %216, %217 : vector<2x32xf32>
    %219 = vector.extract_strided_slice %209 {offsets = [0, 32], sizes = [2, 32], strides = [1, 1]} : vector<2x256xf32> to vector<2x32xf32>
    %220 = vector.extract_strided_slice %208 {offsets = [0, 32], sizes = [2, 32], strides = [1, 1]} : vector<2x256xf32> to vector<2x32xf32>
    %221 = arith.addf %219, %220 : vector<2x32xf32>
    %222 = arith.negf %221 : vector<2x32xf32>
    %223 = math.exp %222 : vector<2x32xf32>
    %cst_41 = arith.constant 1.000000e+00 : f32
    %224 = vector.broadcast %cst_41 : f32 to vector<2x32xf32>
    %225 = arith.addf %224, %223 : vector<2x32xf32>
    %226 = arith.divf %224, %225 : vector<2x32xf32>
    %227 = vector.extract_strided_slice %209 {offsets = [0, 64], sizes = [2, 32], strides = [1, 1]} : vector<2x256xf32> to vector<2x32xf32>
    %228 = vector.extract_strided_slice %208 {offsets = [0, 64], sizes = [2, 32], strides = [1, 1]} : vector<2x256xf32> to vector<2x32xf32>
    %229 = arith.mulf %218, %228 : vector<2x32xf32>
    %230 = arith.addf %227, %229 : vector<2x32xf32>
    %231 = math.tanh %230 : vector<2x32xf32>
    %cst_42 = arith.constant 1.000000e+00 : f32
    %232 = vector.broadcast %cst_42 : f32 to vector<2x32xf32>
    %233 = arith.subf %232, %226 : vector<2x32xf32>
    %234 = arith.mulf %233, %231 : vector<2x32xf32>
    %235 = arith.mulf %226, %177 : vector<2x32xf32>
    %236 = arith.addf %234, %235 : vector<2x32xf32>
    %237 = vector.extract_strided_slice %210 {offsets = [0, 96], sizes = [2, 32], strides = [1, 1]} : vector<2x256xf32> to vector<2x32xf32>
    %238 = vector.extract_strided_slice %208 {offsets = [0, 96], sizes = [2, 32], strides = [1, 1]} : vector<2x256xf32> to vector<2x32xf32>
    %239 = arith.addf %237, %238 : vector<2x32xf32>
    %240 = arith.negf %239 : vector<2x32xf32>
    %241 = math.exp %240 : vector<2x32xf32>
    %cst_43 = arith.constant 1.000000e+00 : f32
    %242 = vector.broadcast %cst_43 : f32 to vector<2x32xf32>
    %243 = arith.addf %242, %241 : vector<2x32xf32>
    %244 = arith.divf %242, %243 : vector<2x32xf32>
    %245 = vector.extract_strided_slice %210 {offsets = [0, 128], sizes = [2, 32], strides = [1, 1]} : vector<2x256xf32> to vector<2x32xf32>
    %246 = vector.extract_strided_slice %208 {offsets = [0, 128], sizes = [2, 32], strides = [1, 1]} : vector<2x256xf32> to vector<2x32xf32>
    %247 = arith.addf %245, %246 : vector<2x32xf32>
    %248 = arith.negf %247 : vector<2x32xf32>
    %249 = math.exp %248 : vector<2x32xf32>
    %cst_44 = arith.constant 1.000000e+00 : f32
    %250 = vector.broadcast %cst_44 : f32 to vector<2x32xf32>
    %251 = arith.addf %250, %249 : vector<2x32xf32>
    %252 = arith.divf %250, %251 : vector<2x32xf32>
    %253 = vector.extract_strided_slice %210 {offsets = [0, 160], sizes = [2, 32], strides = [1, 1]} : vector<2x256xf32> to vector<2x32xf32>
    %254 = vector.extract_strided_slice %208 {offsets = [0, 160], sizes = [2, 32], strides = [1, 1]} : vector<2x256xf32> to vector<2x32xf32>
    %255 = arith.mulf %244, %254 : vector<2x32xf32>
    %256 = arith.addf %253, %255 : vector<2x32xf32>
    %257 = math.tanh %256 : vector<2x32xf32>
    %cst_45 = arith.constant 1.000000e+00 : f32
    %258 = vector.broadcast %cst_45 : f32 to vector<2x32xf32>
    %259 = arith.subf %258, %252 : vector<2x32xf32>
    %260 = arith.mulf %259, %257 : vector<2x32xf32>
    %261 = arith.mulf %252, %203 : vector<2x32xf32>
    %262 = arith.addf %260, %261 : vector<2x32xf32>
    %263 = tpu.concatenate %236, %262 in 1 : vector<2x32xf32>, vector<2x32xf32> -> vector<2x64xf32>
    %264 = arith.truncf %263 : vector<2x64xf32> to vector<2x64xbf16>
    %cst_46 = arith.constant dense<0.000000e+00> : vector<2x256xf32>
    %265 = tpu.matmul %264, %23, %cst_46 {dimension_numbers = #tpu.dot_dimension_numbers<[1], [0], [0], [1], [0, 0, 1, 1], [], []>} : vector<2x64xbf16>, vector<64x256xbf16>, vector<2x256xf32> -> vector<2x256xf32>
    %266 = vector.broadcast %24 : vector<1x256xf32> to vector<2x256xf32>
    %267 = arith.addf %265, %266 : vector<2x256xf32>
    %268 = vector.extract_strided_slice %22 {offsets = [8, 0], sizes = [2, 256], strides = [1, 1]} : vector<16x256xf32> to vector<2x256xf32>
    %269 = vector.extract_strided_slice %22 {offsets = [6, 0], sizes = [2, 256], strides = [1, 1]} : vector<16x256xf32> to vector<2x256xf32>
    %270 = vector.extract_strided_slice %268 {offsets = [0, 0], sizes = [2, 32], strides = [1, 1]} : vector<2x256xf32> to vector<2x32xf32>
    %271 = vector.extract_strided_slice %267 {offsets = [0, 0], sizes = [2, 32], strides = [1, 1]} : vector<2x256xf32> to vector<2x32xf32>
    %272 = arith.addf %270, %271 : vector<2x32xf32>
    %273 = arith.negf %272 : vector<2x32xf32>
    %274 = math.exp %273 : vector<2x32xf32>
    %cst_47 = arith.constant 1.000000e+00 : f32
    %275 = vector.broadcast %cst_47 : f32 to vector<2x32xf32>
    %276 = arith.addf %275, %274 : vector<2x32xf32>
    %277 = arith.divf %275, %276 : vector<2x32xf32>
    %278 = vector.extract_strided_slice %268 {offsets = [0, 32], sizes = [2, 32], strides = [1, 1]} : vector<2x256xf32> to vector<2x32xf32>
    %279 = vector.extract_strided_slice %267 {offsets = [0, 32], sizes = [2, 32], strides = [1, 1]} : vector<2x256xf32> to vector<2x32xf32>
    %280 = arith.addf %278, %279 : vector<2x32xf32>
    %281 = arith.negf %280 : vector<2x32xf32>
    %282 = math.exp %281 : vector<2x32xf32>
    %cst_48 = arith.constant 1.000000e+00 : f32
    %283 = vector.broadcast %cst_48 : f32 to vector<2x32xf32>
    %284 = arith.addf %283, %282 : vector<2x32xf32>
    %285 = arith.divf %283, %284 : vector<2x32xf32>
    %286 = vector.extract_strided_slice %268 {offsets = [0, 64], sizes = [2, 32], strides = [1, 1]} : vector<2x256xf32> to vector<2x32xf32>
    %287 = vector.extract_strided_slice %267 {offsets = [0, 64], sizes = [2, 32], strides = [1, 1]} : vector<2x256xf32> to vector<2x32xf32>
    %288 = arith.mulf %277, %287 : vector<2x32xf32>
    %289 = arith.addf %286, %288 : vector<2x32xf32>
    %290 = math.tanh %289 : vector<2x32xf32>
    %cst_49 = arith.constant 1.000000e+00 : f32
    %291 = vector.broadcast %cst_49 : f32 to vector<2x32xf32>
    %292 = arith.subf %291, %285 : vector<2x32xf32>
    %293 = arith.mulf %292, %290 : vector<2x32xf32>
    %294 = arith.mulf %285, %236 : vector<2x32xf32>
    %295 = arith.addf %293, %294 : vector<2x32xf32>
    %296 = vector.extract_strided_slice %269 {offsets = [0, 96], sizes = [2, 32], strides = [1, 1]} : vector<2x256xf32> to vector<2x32xf32>
    %297 = vector.extract_strided_slice %267 {offsets = [0, 96], sizes = [2, 32], strides = [1, 1]} : vector<2x256xf32> to vector<2x32xf32>
    %298 = arith.addf %296, %297 : vector<2x32xf32>
    %299 = arith.negf %298 : vector<2x32xf32>
    %300 = math.exp %299 : vector<2x32xf32>
    %cst_50 = arith.constant 1.000000e+00 : f32
    %301 = vector.broadcast %cst_50 : f32 to vector<2x32xf32>
    %302 = arith.addf %301, %300 : vector<2x32xf32>
    %303 = arith.divf %301, %302 : vector<2x32xf32>
    %304 = vector.extract_strided_slice %269 {offsets = [0, 128], sizes = [2, 32], strides = [1, 1]} : vector<2x256xf32> to vector<2x32xf32>
    %305 = vector.extract_strided_slice %267 {offsets = [0, 128], sizes = [2, 32], strides = [1, 1]} : vector<2x256xf32> to vector<2x32xf32>
    %306 = arith.addf %304, %305 : vector<2x32xf32>
    %307 = arith.negf %306 : vector<2x32xf32>
    %308 = math.exp %307 : vector<2x32xf32>
    %cst_51 = arith.constant 1.000000e+00 : f32
    %309 = vector.broadcast %cst_51 : f32 to vector<2x32xf32>
    %310 = arith.addf %309, %308 : vector<2x32xf32>
    %311 = arith.divf %309, %310 : vector<2x32xf32>
    %312 = vector.extract_strided_slice %269 {offsets = [0, 160], sizes = [2, 32], strides = [1, 1]} : vector<2x256xf32> to vector<2x32xf32>
    %313 = vector.extract_strided_slice %267 {offsets = [0, 160], sizes = [2, 32], strides = [1, 1]} : vector<2x256xf32> to vector<2x32xf32>
    %314 = arith.mulf %303, %313 : vector<2x32xf32>
    %315 = arith.addf %312, %314 : vector<2x32xf32>
    %316 = math.tanh %315 : vector<2x32xf32>
    %cst_52 = arith.constant 1.000000e+00 : f32
    %317 = vector.broadcast %cst_52 : f32 to vector<2x32xf32>
    %318 = arith.subf %317, %311 : vector<2x32xf32>
    %319 = arith.mulf %318, %316 : vector<2x32xf32>
    %320 = arith.mulf %311, %262 : vector<2x32xf32>
    %321 = arith.addf %319, %320 : vector<2x32xf32>
    %322 = tpu.concatenate %295, %321 in 1 : vector<2x32xf32>, vector<2x32xf32> -> vector<2x64xf32>
    %323 = arith.truncf %322 : vector<2x64xf32> to vector<2x64xbf16>
    %cst_53 = arith.constant dense<0.000000e+00> : vector<2x256xf32>
    %324 = tpu.matmul %323, %23, %cst_53 {dimension_numbers = #tpu.dot_dimension_numbers<[1], [0], [0], [1], [0, 0, 1, 1], [], []>} : vector<2x64xbf16>, vector<64x256xbf16>, vector<2x256xf32> -> vector<2x256xf32>
    %325 = vector.broadcast %24 : vector<1x256xf32> to vector<2x256xf32>
    %326 = arith.addf %324, %325 : vector<2x256xf32>
    %327 = vector.extract_strided_slice %22 {offsets = [10, 0], sizes = [2, 256], strides = [1, 1]} : vector<16x256xf32> to vector<2x256xf32>
    %328 = vector.extract_strided_slice %22 {offsets = [4, 0], sizes = [2, 256], strides = [1, 1]} : vector<16x256xf32> to vector<2x256xf32>
    %329 = vector.extract_strided_slice %327 {offsets = [0, 0], sizes = [2, 32], strides = [1, 1]} : vector<2x256xf32> to vector<2x32xf32>
    %330 = vector.extract_strided_slice %326 {offsets = [0, 0], sizes = [2, 32], strides = [1, 1]} : vector<2x256xf32> to vector<2x32xf32>
    %331 = arith.addf %329, %330 : vector<2x32xf32>
    %332 = arith.negf %331 : vector<2x32xf32>
    %333 = math.exp %332 : vector<2x32xf32>
    %cst_54 = arith.constant 1.000000e+00 : f32
    %334 = vector.broadcast %cst_54 : f32 to vector<2x32xf32>
    %335 = arith.addf %334, %333 : vector<2x32xf32>
    %336 = arith.divf %334, %335 : vector<2x32xf32>
    %337 = vector.extract_strided_slice %327 {offsets = [0, 32], sizes = [2, 32], strides = [1, 1]} : vector<2x256xf32> to vector<2x32xf32>
    %338 = vector.extract_strided_slice %326 {offsets = [0, 32], sizes = [2, 32], strides = [1, 1]} : vector<2x256xf32> to vector<2x32xf32>
    %339 = arith.addf %337, %338 : vector<2x32xf32>
    %340 = arith.negf %339 : vector<2x32xf32>
    %341 = math.exp %340 : vector<2x32xf32>
    %cst_55 = arith.constant 1.000000e+00 : f32
    %342 = vector.broadcast %cst_55 : f32 to vector<2x32xf32>
    %343 = arith.addf %342, %341 : vector<2x32xf32>
    %344 = arith.divf %342, %343 : vector<2x32xf32>
    %345 = vector.extract_strided_slice %327 {offsets = [0, 64], sizes = [2, 32], strides = [1, 1]} : vector<2x256xf32> to vector<2x32xf32>
    %346 = vector.extract_strided_slice %326 {offsets = [0, 64], sizes = [2, 32], strides = [1, 1]} : vector<2x256xf32> to vector<2x32xf32>
    %347 = arith.mulf %336, %346 : vector<2x32xf32>
    %348 = arith.addf %345, %347 : vector<2x32xf32>
    %349 = math.tanh %348 : vector<2x32xf32>
    %cst_56 = arith.constant 1.000000e+00 : f32
    %350 = vector.broadcast %cst_56 : f32 to vector<2x32xf32>
    %351 = arith.subf %350, %344 : vector<2x32xf32>
    %352 = arith.mulf %351, %349 : vector<2x32xf32>
    %353 = arith.mulf %344, %295 : vector<2x32xf32>
    %354 = arith.addf %352, %353 : vector<2x32xf32>
    %355 = vector.extract_strided_slice %328 {offsets = [0, 96], sizes = [2, 32], strides = [1, 1]} : vector<2x256xf32> to vector<2x32xf32>
    %356 = vector.extract_strided_slice %326 {offsets = [0, 96], sizes = [2, 32], strides = [1, 1]} : vector<2x256xf32> to vector<2x32xf32>
    %357 = arith.addf %355, %356 : vector<2x32xf32>
    %358 = arith.negf %357 : vector<2x32xf32>
    %359 = math.exp %358 : vector<2x32xf32>
    %cst_57 = arith.constant 1.000000e+00 : f32
    %360 = vector.broadcast %cst_57 : f32 to vector<2x32xf32>
    %361 = arith.addf %360, %359 : vector<2x32xf32>
    %362 = arith.divf %360, %361 : vector<2x32xf32>
    %363 = vector.extract_strided_slice %328 {offsets = [0, 128], sizes = [2, 32], strides = [1, 1]} : vector<2x256xf32> to vector<2x32xf32>
    %364 = vector.extract_strided_slice %326 {offsets = [0, 128], sizes = [2, 32], strides = [1, 1]} : vector<2x256xf32> to vector<2x32xf32>
    %365 = arith.addf %363, %364 : vector<2x32xf32>
    %366 = arith.negf %365 : vector<2x32xf32>
    %367 = math.exp %366 : vector<2x32xf32>
    %cst_58 = arith.constant 1.000000e+00 : f32
    %368 = vector.broadcast %cst_58 : f32 to vector<2x32xf32>
    %369 = arith.addf %368, %367 : vector<2x32xf32>
    %370 = arith.divf %368, %369 : vector<2x32xf32>
    %371 = vector.extract_strided_slice %328 {offsets = [0, 160], sizes = [2, 32], strides = [1, 1]} : vector<2x256xf32> to vector<2x32xf32>
    %372 = vector.extract_strided_slice %326 {offsets = [0, 160], sizes = [2, 32], strides = [1, 1]} : vector<2x256xf32> to vector<2x32xf32>
    %373 = arith.mulf %362, %372 : vector<2x32xf32>
    %374 = arith.addf %371, %373 : vector<2x32xf32>
    %375 = math.tanh %374 : vector<2x32xf32>
    %cst_59 = arith.constant 1.000000e+00 : f32
    %376 = vector.broadcast %cst_59 : f32 to vector<2x32xf32>
    %377 = arith.subf %376, %370 : vector<2x32xf32>
    %378 = arith.mulf %377, %375 : vector<2x32xf32>
    %379 = arith.mulf %370, %321 : vector<2x32xf32>
    %380 = arith.addf %378, %379 : vector<2x32xf32>
    %381 = tpu.concatenate %354, %380 in 1 : vector<2x32xf32>, vector<2x32xf32> -> vector<2x64xf32>
    %382 = arith.truncf %381 : vector<2x64xf32> to vector<2x64xbf16>
    %cst_60 = arith.constant dense<0.000000e+00> : vector<2x256xf32>
    %383 = tpu.matmul %382, %23, %cst_60 {dimension_numbers = #tpu.dot_dimension_numbers<[1], [0], [0], [1], [0, 0, 1, 1], [], []>} : vector<2x64xbf16>, vector<64x256xbf16>, vector<2x256xf32> -> vector<2x256xf32>
    %384 = vector.broadcast %24 : vector<1x256xf32> to vector<2x256xf32>
    %385 = arith.addf %383, %384 : vector<2x256xf32>
    %386 = vector.extract_strided_slice %22 {offsets = [12, 0], sizes = [2, 256], strides = [1, 1]} : vector<16x256xf32> to vector<2x256xf32>
    %387 = vector.extract_strided_slice %22 {offsets = [2, 0], sizes = [2, 256], strides = [1, 1]} : vector<16x256xf32> to vector<2x256xf32>
    %388 = vector.extract_strided_slice %386 {offsets = [0, 0], sizes = [2, 32], strides = [1, 1]} : vector<2x256xf32> to vector<2x32xf32>
    %389 = vector.extract_strided_slice %385 {offsets = [0, 0], sizes = [2, 32], strides = [1, 1]} : vector<2x256xf32> to vector<2x32xf32>
    %390 = arith.addf %388, %389 : vector<2x32xf32>
    %391 = arith.negf %390 : vector<2x32xf32>
    %392 = math.exp %391 : vector<2x32xf32>
    %cst_61 = arith.constant 1.000000e+00 : f32
    %393 = vector.broadcast %cst_61 : f32 to vector<2x32xf32>
    %394 = arith.addf %393, %392 : vector<2x32xf32>
    %395 = arith.divf %393, %394 : vector<2x32xf32>
    %396 = vector.extract_strided_slice %386 {offsets = [0, 32], sizes = [2, 32], strides = [1, 1]} : vector<2x256xf32> to vector<2x32xf32>
    %397 = vector.extract_strided_slice %385 {offsets = [0, 32], sizes = [2, 32], strides = [1, 1]} : vector<2x256xf32> to vector<2x32xf32>
    %398 = arith.addf %396, %397 : vector<2x32xf32>
    %399 = arith.negf %398 : vector<2x32xf32>
    %400 = math.exp %399 : vector<2x32xf32>
    %cst_62 = arith.constant 1.000000e+00 : f32
    %401 = vector.broadcast %cst_62 : f32 to vector<2x32xf32>
    %402 = arith.addf %401, %400 : vector<2x32xf32>
    %403 = arith.divf %401, %402 : vector<2x32xf32>
    %404 = vector.extract_strided_slice %386 {offsets = [0, 64], sizes = [2, 32], strides = [1, 1]} : vector<2x256xf32> to vector<2x32xf32>
    %405 = vector.extract_strided_slice %385 {offsets = [0, 64], sizes = [2, 32], strides = [1, 1]} : vector<2x256xf32> to vector<2x32xf32>
    %406 = arith.mulf %395, %405 : vector<2x32xf32>
    %407 = arith.addf %404, %406 : vector<2x32xf32>
    %408 = math.tanh %407 : vector<2x32xf32>
    %cst_63 = arith.constant 1.000000e+00 : f32
    %409 = vector.broadcast %cst_63 : f32 to vector<2x32xf32>
    %410 = arith.subf %409, %403 : vector<2x32xf32>
    %411 = arith.mulf %410, %408 : vector<2x32xf32>
    %412 = arith.mulf %403, %354 : vector<2x32xf32>
    %413 = arith.addf %411, %412 : vector<2x32xf32>
    %414 = vector.extract_strided_slice %387 {offsets = [0, 96], sizes = [2, 32], strides = [1, 1]} : vector<2x256xf32> to vector<2x32xf32>
    %415 = vector.extract_strided_slice %385 {offsets = [0, 96], sizes = [2, 32], strides = [1, 1]} : vector<2x256xf32> to vector<2x32xf32>
    %416 = arith.addf %414, %415 : vector<2x32xf32>
    %417 = arith.negf %416 : vector<2x32xf32>
    %418 = math.exp %417 : vector<2x32xf32>
    %cst_64 = arith.constant 1.000000e+00 : f32
    %419 = vector.broadcast %cst_64 : f32 to vector<2x32xf32>
    %420 = arith.addf %419, %418 : vector<2x32xf32>
    %421 = arith.divf %419, %420 : vector<2x32xf32>
    %422 = vector.extract_strided_slice %387 {offsets = [0, 128], sizes = [2, 32], strides = [1, 1]} : vector<2x256xf32> to vector<2x32xf32>
    %423 = vector.extract_strided_slice %385 {offsets = [0, 128], sizes = [2, 32], strides = [1, 1]} : vector<2x256xf32> to vector<2x32xf32>
    %424 = arith.addf %422, %423 : vector<2x32xf32>
    %425 = arith.negf %424 : vector<2x32xf32>
    %426 = math.exp %425 : vector<2x32xf32>
    %cst_65 = arith.constant 1.000000e+00 : f32
    %427 = vector.broadcast %cst_65 : f32 to vector<2x32xf32>
    %428 = arith.addf %427, %426 : vector<2x32xf32>
    %429 = arith.divf %427, %428 : vector<2x32xf32>
    %430 = vector.extract_strided_slice %387 {offsets = [0, 160], sizes = [2, 32], strides = [1, 1]} : vector<2x256xf32> to vector<2x32xf32>
    %431 = vector.extract_strided_slice %385 {offsets = [0, 160], sizes = [2, 32], strides = [1, 1]} : vector<2x256xf32> to vector<2x32xf32>
    %432 = arith.mulf %421, %431 : vector<2x32xf32>
    %433 = arith.addf %430, %432 : vector<2x32xf32>
    %434 = math.tanh %433 : vector<2x32xf32>
    %cst_66 = arith.constant 1.000000e+00 : f32
    %435 = vector.broadcast %cst_66 : f32 to vector<2x32xf32>
    %436 = arith.subf %435, %429 : vector<2x32xf32>
    %437 = arith.mulf %436, %434 : vector<2x32xf32>
    %438 = arith.mulf %429, %380 : vector<2x32xf32>
    %439 = arith.addf %437, %438 : vector<2x32xf32>
    %440 = tpu.concatenate %413, %439 in 1 : vector<2x32xf32>, vector<2x32xf32> -> vector<2x64xf32>
    %441 = arith.truncf %440 : vector<2x64xf32> to vector<2x64xbf16>
    %cst_67 = arith.constant dense<0.000000e+00> : vector<2x256xf32>
    %442 = tpu.matmul %441, %23, %cst_67 {dimension_numbers = #tpu.dot_dimension_numbers<[1], [0], [0], [1], [0, 0, 1, 1], [], []>} : vector<2x64xbf16>, vector<64x256xbf16>, vector<2x256xf32> -> vector<2x256xf32>
    %443 = vector.broadcast %24 : vector<1x256xf32> to vector<2x256xf32>
    %444 = arith.addf %442, %443 : vector<2x256xf32>
    %445 = vector.extract_strided_slice %22 {offsets = [14, 0], sizes = [2, 256], strides = [1, 1]} : vector<16x256xf32> to vector<2x256xf32>
    %446 = vector.extract_strided_slice %22 {offsets = [0, 0], sizes = [2, 256], strides = [1, 1]} : vector<16x256xf32> to vector<2x256xf32>
    %447 = vector.extract_strided_slice %445 {offsets = [0, 0], sizes = [2, 32], strides = [1, 1]} : vector<2x256xf32> to vector<2x32xf32>
    %448 = vector.extract_strided_slice %444 {offsets = [0, 0], sizes = [2, 32], strides = [1, 1]} : vector<2x256xf32> to vector<2x32xf32>
    %449 = arith.addf %447, %448 : vector<2x32xf32>
    %450 = arith.negf %449 : vector<2x32xf32>
    %451 = math.exp %450 : vector<2x32xf32>
    %cst_68 = arith.constant 1.000000e+00 : f32
    %452 = vector.broadcast %cst_68 : f32 to vector<2x32xf32>
    %453 = arith.addf %452, %451 : vector<2x32xf32>
    %454 = arith.divf %452, %453 : vector<2x32xf32>
    %455 = vector.extract_strided_slice %445 {offsets = [0, 32], sizes = [2, 32], strides = [1, 1]} : vector<2x256xf32> to vector<2x32xf32>
    %456 = vector.extract_strided_slice %444 {offsets = [0, 32], sizes = [2, 32], strides = [1, 1]} : vector<2x256xf32> to vector<2x32xf32>
    %457 = arith.addf %455, %456 : vector<2x32xf32>
    %458 = arith.negf %457 : vector<2x32xf32>
    %459 = math.exp %458 : vector<2x32xf32>
    %cst_69 = arith.constant 1.000000e+00 : f32
    %460 = vector.broadcast %cst_69 : f32 to vector<2x32xf32>
    %461 = arith.addf %460, %459 : vector<2x32xf32>
    %462 = arith.divf %460, %461 : vector<2x32xf32>
    %463 = vector.extract_strided_slice %445 {offsets = [0, 64], sizes = [2, 32], strides = [1, 1]} : vector<2x256xf32> to vector<2x32xf32>
    %464 = vector.extract_strided_slice %444 {offsets = [0, 64], sizes = [2, 32], strides = [1, 1]} : vector<2x256xf32> to vector<2x32xf32>
    %465 = arith.mulf %454, %464 : vector<2x32xf32>
    %466 = arith.addf %463, %465 : vector<2x32xf32>
    %467 = math.tanh %466 : vector<2x32xf32>
    %cst_70 = arith.constant 1.000000e+00 : f32
    %468 = vector.broadcast %cst_70 : f32 to vector<2x32xf32>
    %469 = arith.subf %468, %462 : vector<2x32xf32>
    %470 = arith.mulf %469, %467 : vector<2x32xf32>
    %471 = arith.mulf %462, %413 : vector<2x32xf32>
    %472 = arith.addf %470, %471 : vector<2x32xf32>
    %473 = vector.extract_strided_slice %446 {offsets = [0, 96], sizes = [2, 32], strides = [1, 1]} : vector<2x256xf32> to vector<2x32xf32>
    %474 = vector.extract_strided_slice %444 {offsets = [0, 96], sizes = [2, 32], strides = [1, 1]} : vector<2x256xf32> to vector<2x32xf32>
    %475 = arith.addf %473, %474 : vector<2x32xf32>
    %476 = arith.negf %475 : vector<2x32xf32>
    %477 = math.exp %476 : vector<2x32xf32>
    %cst_71 = arith.constant 1.000000e+00 : f32
    %478 = vector.broadcast %cst_71 : f32 to vector<2x32xf32>
    %479 = arith.addf %478, %477 : vector<2x32xf32>
    %480 = arith.divf %478, %479 : vector<2x32xf32>
    %481 = vector.extract_strided_slice %446 {offsets = [0, 128], sizes = [2, 32], strides = [1, 1]} : vector<2x256xf32> to vector<2x32xf32>
    %482 = vector.extract_strided_slice %444 {offsets = [0, 128], sizes = [2, 32], strides = [1, 1]} : vector<2x256xf32> to vector<2x32xf32>
    %483 = arith.addf %481, %482 : vector<2x32xf32>
    %484 = arith.negf %483 : vector<2x32xf32>
    %485 = math.exp %484 : vector<2x32xf32>
    %cst_72 = arith.constant 1.000000e+00 : f32
    %486 = vector.broadcast %cst_72 : f32 to vector<2x32xf32>
    %487 = arith.addf %486, %485 : vector<2x32xf32>
    %488 = arith.divf %486, %487 : vector<2x32xf32>
    %489 = vector.extract_strided_slice %446 {offsets = [0, 160], sizes = [2, 32], strides = [1, 1]} : vector<2x256xf32> to vector<2x32xf32>
    %490 = vector.extract_strided_slice %444 {offsets = [0, 160], sizes = [2, 32], strides = [1, 1]} : vector<2x256xf32> to vector<2x32xf32>
    %491 = arith.mulf %480, %490 : vector<2x32xf32>
    %492 = arith.addf %489, %491 : vector<2x32xf32>
    %493 = math.tanh %492 : vector<2x32xf32>
    %cst_73 = arith.constant 1.000000e+00 : f32
    %494 = vector.broadcast %cst_73 : f32 to vector<2x32xf32>
    %495 = arith.subf %494, %488 : vector<2x32xf32>
    %496 = arith.mulf %495, %493 : vector<2x32xf32>
    %497 = arith.mulf %488, %439 : vector<2x32xf32>
    %498 = arith.addf %496, %497 : vector<2x32xf32>
    %499 = tpu.concatenate %59, %498 in 1 : vector<2x32xf32>, vector<2x32xf32> -> vector<2x64xf32>
    %500 = tpu.concatenate %118, %439 in 1 : vector<2x32xf32>, vector<2x32xf32> -> vector<2x64xf32>
    %501 = tpu.concatenate %177, %380 in 1 : vector<2x32xf32>, vector<2x32xf32> -> vector<2x64xf32>
    %502 = tpu.concatenate %236, %321 in 1 : vector<2x32xf32>, vector<2x32xf32> -> vector<2x64xf32>
    %503 = tpu.concatenate %295, %262 in 1 : vector<2x32xf32>, vector<2x32xf32> -> vector<2x64xf32>
    %504 = tpu.concatenate %354, %203 in 1 : vector<2x32xf32>, vector<2x32xf32> -> vector<2x64xf32>
    %505 = tpu.concatenate %413, %144 in 1 : vector<2x32xf32>, vector<2x32xf32> -> vector<2x64xf32>
    %506 = tpu.concatenate %472, %85 in 1 : vector<2x32xf32>, vector<2x32xf32> -> vector<2x64xf32>
    %507 = tpu.concatenate %499, %500, %501, %502, %503, %504, %505, %506 in 0 : vector<2x64xf32>, vector<2x64xf32>, vector<2x64xf32>, vector<2x64xf32>, vector<2x64xf32>, vector<2x64xf32>, vector<2x64xf32>, vector<2x64xf32> -> vector<16x64xf32>
    %508 = arith.truncf %507 : vector<16x64xf32> to vector<16x64xbf16>
    %c0_74 = arith.constant 0 : index
    %c0_75 = arith.constant 0 : index
    %509 = vector.load %arg8[%c0_74, %c0_75] : memref<64x128xbf16, #tpu.memory_space<vmem>>, vector<64x128xbf16>
    %cst_76 = arith.constant dense<0.000000e+00> : vector<16x128xf32>
    %510 = tpu.matmul %508, %509, %cst_76 {dimension_numbers = #tpu.dot_dimension_numbers<[1], [0], [0], [1], [0, 0, 1, 1], [], []>} : vector<16x64xbf16>, vector<64x128xbf16>, vector<16x128xf32> -> vector<16x128xf32>
    %c0_77 = arith.constant 0 : index
    %c0_78 = arith.constant 0 : index
    %511 = vector.load %arg9[%c0_77, %c0_78] : memref<1x128xf32, #tpu.memory_space<vmem>>, vector<1x128xf32>
    %512 = vector.broadcast %511 : vector<1x128xf32> to vector<16x128xf32>
    %513 = arith.addf %510, %512 : vector<16x128xf32>
    %cst_79 = arith.constant dense<0xFF800000> : vector<16xf32>
    %514 = vector.multi_reduction <maximumf>, %513, %cst_79 [1] : vector<16x128xf32> to vector<16xf32>
    %515 = vector.shape_cast %514 : vector<16xf32> to vector<16x1xf32>
    %516 = vector.broadcast %515 : vector<16x1xf32> to vector<16x128xf32>
    %517 = arith.subf %513, %516 : vector<16x128xf32>
    %518 = math.exp %517 : vector<16x128xf32>
    %cst_80 = arith.constant dense<0.000000e+00> : vector<16xf32>
    %519 = vector.multi_reduction <add>, %518, %cst_80 [1] : vector<16x128xf32> to vector<16xf32>
    %520 = vector.shape_cast %519 : vector<16xf32> to vector<16x1xf32>
    %521 = tpu.reciprocal %520 {approx = true} : vector<16x1xf32> -> vector<16x1xf32>
    %522 = vector.broadcast %521 : vector<16x1xf32> to vector<16x128xf32>
    %523 = arith.mulf %518, %522 : vector<16x128xf32>
    %c0_81 = arith.constant 0 : index
    %c0_82 = arith.constant 0 : index
    %524 = vector.load %arg10[%c0_81, %c0_82] : memref<16x128xf32, #tpu.memory_space<vmem>>, vector<16x128xf32>
    tpu.vector_store %arg10[%c0_81, %c0_82], %523 {strides = array<i32>} : memref<16x128xf32, #tpu.memory_space<vmem>>, vector<16x128xf32>,
    return
  }
  func.func @transform_0(%arg0: i32) -> (i32, i32) {
    %c0_i32 = arith.constant 0 : i32
    %c0_i32_0 = arith.constant 0 : i32
    %c0_i32_1 = arith.constant 0 : i32
    return %c0_i32, %c0_i32_0 : i32, i32
  }
  func.func @transform_1(%arg0: i32) -> (i32, i32) {
    %c0_i32 = arith.constant 0 : i32
    %c0_i32_0 = arith.constant 0 : i32
    %c0_i32_1 = arith.constant 0 : i32
    return %c0_i32, %c0_i32_0 : i32, i32
  }
  func.func @transform_2(%arg0: i32) -> (i32, i32) {
    %c0_i32 = arith.constant 0 : i32
    %c0_i32_0 = arith.constant 0 : i32
    %c0_i32_1 = arith.constant 0 : i32
    return %c0_i32, %c0_i32_0 : i32, i32
  }
  func.func @transform_3(%arg0: i32) -> (i32, i32) {
    %c0_i32 = arith.constant 0 : i32
    %c0_i32_0 = arith.constant 0 : i32
    %c0_i32_1 = arith.constant 0 : i32
    return %c0_i32, %c0_i32_0 : i32, i32
  }
  func.func @transform_4(%arg0: i32) -> (i32, i32) {
    %c0_i32 = arith.constant 0 : i32
    %c0_i32_0 = arith.constant 0 : i32
    %c0_i32_1 = arith.constant 0 : i32
    return %c0_i32, %c0_i32_0 : i32, i32
  }
  func.func @transform_5(%arg0: i32) -> (i32, i32) {
    %c0_i32 = arith.constant 0 : i32
    %c0_i32_0 = arith.constant 0 : i32
    %c0_i32_1 = arith.constant 0 : i32
    return %c0_i32, %c0_i32_0 : i32, i32
  }
  func.func @transform_6(%arg0: i32) -> (i32, i32) {
    %c0_i32 = arith.constant 0 : i32
    %c0_i32_0 = arith.constant 0 : i32
    %c0_i32_1 = arith.constant 0 : i32
    return %c0_i32, %c0_i32_0 : i32, i32
  }
  func.func @transform_7(%arg0: i32) -> (i32, i32) {
    %c0_i32 = arith.constant 0 : i32
    %c0_i32_0 = arith.constant 0 : i32
    %c0_i32_1 = arith.constant 0 : i32
    return %c0_i32, %c0_i32_0 : i32, i32
  }
  func.func @transform_8(%arg0: i32) -> (i32, i32) {
    %c0_i32 = arith.constant 0 : i32
    %c0_i32_0 = arith.constant 0 : i32
    %c0_i32_1 = arith.constant 0 : i32
    return %c0_i32, %c0_i32_0 : i32, i32
  }
  func.func @transform_9(%arg0: i32) -> (i32, i32) {
    %c0_i32 = arith.constant 0 : i32
    %c0_i32_0 = arith.constant 0 : i32
    %c0_i32_1 = arith.constant 0 : i32
    return %c0_i32, %c0_i32_0 : i32, i32
  }
}

</mosaic_0001>

<bundles_post_ra>
// kernel: crnn_forward.2
= control target key start
LH: loop header
LB: loop body
LE: loop exit
PB: predicated region body
PF: predicated region fallthrough
CT: control target
= control target key end

     0   :  { %v981_v0 = vmov 0   ;;  %vm278_vm0 = vcmask 261120   ;;  %s1229_s1 = inlined_call_operand.vmem [shape: bf16[160,128], index: 1, kind: input, shape index: {}]   ;;  %s1230_s0 = inlined_call_operand.vmem [shape: bf16[256,160], index: 0, kind: input, shape index: {}]   ;;  %s1231_s2 = inlined_call_operand.vmem [shape: f32[1,128], index: 2, kind: input, shape index: {}]   ;;  %s1232_s3 = inlined_call_operand.vmem [shape: bf16[256,128], index: 3, kind: output, shape index: {}]  }
   0x1   :  { %327 = vmatprep.subr.bf16.mxu0 %v981_v0  ;;  %902 = vmatprep.subr.bf16.mxu1 %v981_v0  ;;  %v923_v1 = vld [vmem:[%s1229_s1] sm:$0xff]   ;;  %v924_v2 = vld [vmem:[%s1229_s1 + $0x8] sm:$0xff]   ;;  %v925_v3 = vld [vmem:[%s1229_s1 + $0x10] sm:$0xff]  }
   0x2   :  { %328 = vmatpush1.bf16.msra.mxu0 %v923_v1  ;;  %912 = vmatpush1.bf16.msra.mxu1 %v923_v1  ;;  %v926_v4 = vld [vmem:[%s1229_s1 + $0x18] sm:$0xff]   ;;  %v935_v5 = vld [vmem:[%s1230_s0 + $0x4] ss:$8 sps:$4 sm:$0xff]   ;;  %v929_v9 = vld [vmem:[%s1229_s1 + $0x30] sm:$0xff]  }
   0x3   :  { %329 = vmatprep.subr.bf16.mxu0 %v981_v0  ;;  %903 = vmatprep.subr.bf16.mxu1 %v981_v0  ;;  %v938_v6 = vld [vmem:[%s1230_s0 + $0x84] ss:$8 sps:$4 sm:$0xff]   ;;  %v930_v10 = vld [vmem:[%s1229_s1 + $0x38] sm:$0xff]   ;;  %v933_v13 = vld [vmem:[%s1230_s0] ss:$8 sps:$4 sm:$0xff]  }
   0x4   :  { %727 = vmatprep.mubr.msk.bf16.mxu0 %vm278_vm0, %v935_v5  ;;  %v927_v7 = vld [vmem:[%s1229_s1 + $0x20] sm:$0xff]   ;;  %735 = vmatprep.mubr.msk.bf16.mxu1 %vm278_vm0, %v938_v6  ;;  %v928_v8 = vld [vmem:[%s1229_s1 + $0x28] sm:$0xff]   ;;  %v939_v15 = vld [vmem:[%s1230_s0 + $0x14] ss:$8 sps:$4 sm:$0xff]  }
   0x5   :  { %v931_v11 = vld [vmem:[%s1229_s1 + $0x40] sm:$0xff]   ;;  %v932_v12 = vld [vmem:[%s1229_s1 + $0x48] sm:$0xff]   ;;  %v941_v16 = vld [vmem:[%s1230_s0 + $0x94] ss:$8 sps:$4 sm:$0xff]  }
   0x6   :  { %330 = vmatpush1.bf16.msra.mxu0 %v924_v2  ;;  %913 = vmatpush1.bf16.msra.mxu1 %v924_v2  ;;  %v936_v14 = vld [vmem:[%s1230_s0 + $0x80] ss:$8 sps:$4 sm:$0xff]   ;;  %v943_v17 = vld [vmem:[%s1230_s0 + $0x10] ss:$8 sps:$4 sm:$0xff]   ;;  %v945_v19 = vld [vmem:[%s1230_s0 + $0x24] ss:$8 sps:$4 sm:$0xff]  }
   0x7   :  { %331 = vmatprep.subr.bf16.mxu0 %v981_v0  ;;  %904 = vmatprep.subr.bf16.mxu1 %v981_v0  ;;  %v944_v18 = vld [vmem:[%s1230_s0 + $0x90] ss:$8 sps:$4 sm:$0xff]   ;;  %v947_v20 = vld [vmem:[%s1230_s0 + $0xa4] ss:$8 sps:$4 sm:$0xff]   ;;  %v949_v21 = vld [vmem:[%s1230_s0 + $0x20] ss:$8 sps:$4 sm:$0xff]  }
   0x8   :  { %v950_v22 = vld [vmem:[%s1230_s0 + $0xa0] ss:$8 sps:$4 sm:$0xff]   ;;  %v951_v23 = vld [vmem:[%s1230_s0 + $0x34] ss:$8 sps:$4 sm:$0xff]   ;;  %v955_v25 = vld [vmem:[%s1230_s0 + $0x30] ss:$8 sps:$4 sm:$0xff]  }
   0x9   :  { %v953_v24 = vld [vmem:[%s1230_s0 + $0xb4] ss:$8 sps:$4 sm:$0xff]   ;;  %v956_v26 = vld [vmem:[%s1230_s0 + $0xb0] ss:$8 sps:$4 sm:$0xff]   ;;  %v957_v27 = vld [vmem:[%s1230_s0 + $0x44] ss:$8 sps:$4 sm:$0xff]  }
   0xa   :  { %332 = vmatpush1.bf16.msra.mxu0 %v925_v3  ;;  %914 = vmatpush1.bf16.msra.mxu1 %v925_v3  ;;  %v959_v28 = vld [vmem:[%s1230_s0 + $0xc4] ss:$8 sps:$4 sm:$0xff]   ;;  %v961_v29 = vld [vmem:[%s1230_s0 + $0x40] ss:$8 sps:$4 sm:$0xff]   ;;  %v963_v31 = vld [vmem:[%s1230_s0 + $0x54] ss:$8 sps:$4 sm:$0xff]  }
   0xb   :  { %333 = vmatprep.subr.bf16.mxu0 %v981_v0  ;;  %905 = vmatprep.subr.bf16.mxu1 %v981_v0  ;;  %v962_v30 = vld [vmem:[%s1230_s0 + $0xc0] ss:$8 sps:$4 sm:$0xff]   ;;  %v965_v32 = vld [vmem:[%s1230_s0 + $0xd4] ss:$8 sps:$4 sm:$0xff]   ;;  %v967_v33 = vld [vmem:[%s1230_s0 + $0x50] ss:$8 sps:$4 sm:$0xff]  }
   0xc   :  { %v968_v34 = vld [vmem:[%s1230_s0 + $0xd0] ss:$8 sps:$4 sm:$0xff]   ;;  %v969_v35 = vld [vmem:[%s1230_s0 + $0x64] ss:$8 sps:$4 sm:$0xff]   ;;  %v973_v37 = vld [vmem:[%s1230_s0 + $0x60] ss:$8 sps:$4 sm:$0xff]  }
   0xd   :  { %v971_v36 = vld [vmem:[%s1230_s0 + $0xe4] ss:$8 sps:$4 sm:$0xff]   ;;  %v974_v38 = vld [vmem:[%s1230_s0 + $0xe0] ss:$8 sps:$4 sm:$0xff]   ;;  %v975_v39 = vld [vmem:[%s1230_s0 + $0x74] ss:$8 sps:$4 sm:$0xff]  }
   0xe   :  { %334 = vmatpush1.bf16.msra.mxu0 %v926_v4  ;;  %915 = vmatpush1.bf16.msra.mxu1 %v926_v4  ;;  %v977_v40 = vld [vmem:[%s1230_s0 + $0xf4] ss:$8 sps:$4 sm:$0xff]   ;;  %v979_v41 = vld [vmem:[%s1230_s0 + $0x70] ss:$8 sps:$4 sm:$0xff]   ;;  %v1147_v43 = vld [vmem:[%s1231_s2] ss:$0 sm:$0xff] }
   0xf   :  { %335 = vmatprep.subr.bf16.mxu0 %v981_v0  ;;  %906 = vmatprep.subr.bf16.mxu1 %v981_v0  ;;  %v980_v42 = vld [vmem:[%s1230_s0 + $0xf0] ss:$8 sps:$4 sm:$0xff]  }
  0x12   :  { %336 = vmatpush1.bf16.msra.mxu0 %v927_v7  ;;  %916 = vmatpush1.bf16.msra.mxu1 %v927_v7 }
  0x13   :  { %337 = vmatprep.subr.bf16.mxu0 %v981_v0  ;;  %907 = vmatprep.subr.bf16.mxu1 %v981_v0 }
  0x16   :  { %338 = vmatpush1.bf16.msra.mxu0 %v928_v8  ;;  %917 = vmatpush1.bf16.msra.mxu1 %v928_v8 }
  0x17   :  { %339 = vmatprep.subr.bf16.mxu0 %v981_v0  ;;  %908 = vmatprep.subr.bf16.mxu1 %v981_v0 }
  0x1a   :  { %340 = vmatpush1.bf16.msra.mxu0 %v929_v9  ;;  %918 = vmatpush1.bf16.msra.mxu1 %v929_v9 }
  0x1b   :  { %341 = vmatprep.subr.bf16.mxu0 %v981_v0  ;;  %909 = vmatprep.subr.bf16.mxu1 %v981_v0 }
  0x1e   :  { %342 = vmatpush1.bf16.msra.mxu0 %v930_v10  ;;  %919 = vmatpush1.bf16.msra.mxu1 %v930_v10 }
  0x1f   :  { %343 = vmatprep.subr.bf16.mxu0 %v981_v0  ;;  %910 = vmatprep.subr.bf16.mxu1 %v981_v0 }
  0x22   :  { %344 = vmatpush1.bf16.msra.mxu0 %v931_v11  ;;  %920 = vmatpush1.bf16.msra.mxu1 %v931_v11 }
  0x23   :  { %345 = vmatprep.subr.bf16.mxu0 %v981_v0  ;;  %911 = vmatprep.subr.bf16.mxu1 %v981_v0 }
  0x26   :  { %346 = vmatpush1.bf16.msra.mxu0 %v932_v12  ;;  %921 = vmatpush1.bf16.msra.mxu1 %v932_v12 }
  0x29   :  { %360 = vmatmul.mubr.bf16.vlgmr.msra.gmra.mrb[0].mxu0 %v933_v13  ;;  %424 = vmatmul.mubr.bf16.vlgmr.msra.gmra.mrb[0].mxu1 %v936_v14 }
  0x2a   :  { %728 = vmatprep.mubr.msk.bf16.mxu0 %vm278_vm0, %v939_v15  ;;  %736 = vmatprep.mubr.msk.bf16.mxu1 %vm278_vm0, %v941_v16 }
  0x31   :  { %368 = vmatmul.mubr.bf16.gmra.mrb[4].mxu0 %v943_v17  ;;  %432 = vmatmul.mubr.bf16.gmra.mrb[4].mxu1 %v944_v18 }
  0x32   :  { %729 = vmatprep.mubr.msk.bf16.mxu0 %vm278_vm0, %v945_v19  ;;  %737 = vmatprep.mubr.msk.bf16.mxu1 %vm278_vm0, %v947_v20 }
  0x39   :  { %376 = vmatmul.mubr.bf16.gmra.mrb[8].mxu0 %v949_v21  ;;  %440 = vmatmul.mubr.bf16.gmra.mrb[8].mxu1 %v950_v22 }
  0x3a   :  { %730 = vmatprep.mubr.msk.bf16.mxu0 %vm278_vm0, %v951_v23  ;;  %738 = vmatprep.mubr.msk.bf16.mxu1 %vm278_vm0, %v953_v24 }
  0x41   :  { %384 = vmatmul.mubr.bf16.gmra.mrb[12].mxu0 %v955_v25  ;;  %448 = vmatmul.mubr.bf16.gmra.mrb[12].mxu1 %v956_v26 }
  0x42   :  { %731 = vmatprep.mubr.msk.bf16.mxu0 %vm278_vm0, %v957_v27  ;;  %739 = vmatprep.mubr.msk.bf16.mxu1 %vm278_vm0, %v959_v28 }
  0x49   :  { %392 = vmatmul.mubr.bf16.gmra.mrb[16].mxu0 %v961_v29  ;;  %456 = vmatmul.mubr.bf16.gmra.mrb[16].mxu1 %v962_v30 }
  0x4a   :  { %732 = vmatprep.mubr.msk.bf16.mxu0 %vm278_vm0, %v963_v31  ;;  %740 = vmatprep.mubr.msk.bf16.mxu1 %vm278_vm0, %v965_v32 }
  0x51   :  { %400 = vmatmul.mubr.bf16.gmra.mrb[20].mxu0 %v967_v33  ;;  %464 = vmatmul.mubr.bf16.gmra.mrb[20].mxu1 %v968_v34 }
  0x52   :  { %733 = vmatprep.mubr.msk.bf16.mxu0 %vm278_vm0, %v969_v35  ;;  %741 = vmatprep.mubr.msk.bf16.mxu1 %vm278_vm0, %v971_v36 }
  0x59   :  { %408 = vmatmul.mubr.bf16.gmra.mrb[24].mxu0 %v973_v37  ;;  %472 = vmatmul.mubr.bf16.gmra.mrb[24].mxu1 %v974_v38 }
  0x5a   :  { %734 = vmatprep.mubr.msk.bf16.mxu0 %vm278_vm0, %v975_v39  ;;  %742 = vmatprep.mubr.msk.bf16.mxu1 %vm278_vm0, %v977_v40 }
  0x61   :  { %416 = vmatmul.mubr.bf16.gmra.mrb[28].mxu0 %v979_v41  ;;  %480 = vmatmul.mubr.bf16.gmra.mrb[28].mxu1 %v980_v42 }
  0xfc   :  { %v361_v44 = vpop.f32.mrb[0].mxu0  ;;  %v425_v45 = vpop.f32.mrb[0].mxu1 }
  0xfd   :  { %v362_v46 = vadd.f32 %v1147_v43, %v361_v44  ;;  %v426_v47 = vadd.f32 %v1147_v43, %v425_v45  ;;  %v363_v48 = vpop.f32.mrb[1].mxu0  ;;  %v427_v49 = vpop.f32.mrb[1].mxu1 }
  0xfe   :  { %v364_v50 = vpop.f32.mrb[2].mxu0  ;;  %v428_v51 = vpop.f32.mrb[2].mxu1 }
  0xff   :  { %v365_v52 = vadd.f32 %v1147_v43, %v364_v50  ;;  %v429_v53 = vadd.f32 %v1147_v43, %v428_v51  ;;  %v366_v54 = vpop.f32.mrb[3].mxu0  ;;  %v430_v55 = vpop.f32.mrb[3].mxu1  ;;  %v488_v56 = vmax.f32 %v362_v46, 0.0  ;;  %v504_v57 = vmax.f32 %v426_v47, 0.0 }
 0x101   :  { %v489_v58 = vmax.f32 %v365_v52, 0.0  ;;  %v505_v59 = vmax.f32 %v429_v53, 0.0 }
 0x103   :  { %v810_v60 = vpack.c.bf16 %v489_v58, %v488_v56  ;;  %v850_v61 = vpack.c.bf16 %v505_v59, %v504_v57 }
 0x104   :  { %v369_v62 = vpop.f32.mrb[4].mxu0  ;;  %v433_v63 = vpop.f32.mrb[4].mxu1 }
 0x105   :  { %811 = vst [vmem:[%s1232_s3] sm:$0xff] %v810_v60   ;;  %894 = vst [vmem:[%s1232_s3 + $0x40] sm:$0xff] %v850_v61   ;;  %v370_v0 = vadd.f32 %v1147_v43, %v369_v62  ;;  %v434_v1 = vadd.f32 %v1147_v43, %v433_v63  ;;  %v371_v2 = vpop.f32.mrb[5].mxu0  ;;  %v435_v3 = vpop.f32.mrb[5].mxu1 }
 0x106   :  { %v372_v4 = vpop.f32.mrb[6].mxu0  ;;  %v436_v5 = vpop.f32.mrb[6].mxu1 }
 0x107   :  { %v373_v6 = vadd.f32 %v1147_v43, %v372_v4  ;;  %v437_v7 = vadd.f32 %v1147_v43, %v436_v5  ;;  %v374_v8 = vpop.f32.mrb[7].mxu0  ;;  %v438_v9 = vpop.f32.mrb[7].mxu1  ;;  %v490_v10 = vmax.f32 %v370_v0, 0.0  ;;  %v506_v11 = vmax.f32 %v434_v1, 0.0 }
 0x109   :  { %v491_v12 = vmax.f32 %v373_v6, 0.0  ;;  %v507_v13 = vmax.f32 %v437_v7, 0.0 }
 0x10b   :  { %v815_v14 = vpack.c.bf16 %v491_v12, %v490_v10  ;;  %v855_v15 = vpack.c.bf16 %v507_v13, %v506_v11 }
 0x10c   :  { %v377_v16 = vpop.f32.mrb[8].mxu0  ;;  %v441_v17 = vpop.f32.mrb[8].mxu1 }
 0x10d   :  { %887 = vst [vmem:[%s1232_s3 + $0x8] sm:$0xff] %v815_v14   ;;  %895 = vst [vmem:[%s1232_s3 + $0x48] sm:$0xff] %v855_v15   ;;  %v378_v18 = vadd.f32 %v1147_v43, %v377_v16  ;;  %v442_v19 = vadd.f32 %v1147_v43, %v441_v17  ;;  %v379_v20 = vpop.f32.mrb[9].mxu0  ;;  %v443_v21 = vpop.f32.mrb[9].mxu1 }
 0x10e   :  { %v380_v22 = vpop.f32.mrb[10].mxu0  ;;  %v444_v23 = vpop.f32.mrb[10].mxu1 }
 0x10f   :  { %v381_v24 = vadd.f32 %v1147_v43, %v380_v22  ;;  %v445_v25 = vadd.f32 %v1147_v43, %v444_v23  ;;  %v382_v26 = vpop.f32.mrb[11].mxu0  ;;  %v446_v27 = vpop.f32.mrb[11].mxu1  ;;  %v492_v28 = vmax.f32 %v378_v18, 0.0  ;;  %v508_v29 = vmax.f32 %v442_v19, 0.0 }
 0x111   :  { %v493_v30 = vmax.f32 %v381_v24, 0.0  ;;  %v509_v31 = vmax.f32 %v445_v25, 0.0 }
 0x113   :  { %v820_v32 = vpack.c.bf16 %v493_v30, %v492_v28  ;;  %v860_v33 = vpack.c.bf16 %v509_v31, %v508_v29 }
 0x114   :  { %v385_v34 = vpop.f32.mrb[12].mxu0  ;;  %v449_v35 = vpop.f32.mrb[12].mxu1 }
 0x115   :  { %888 = vst [vmem:[%s1232_s3 + $0x10] sm:$0xff] %v820_v32   ;;  %896 = vst [vmem:[%s1232_s3 + $0x50] sm:$0xff] %v860_v33   ;;  %v386_v36 = vadd.f32 %v1147_v43, %v385_v34  ;;  %v450_v37 = vadd.f32 %v1147_v43, %v449_v35  ;;  %v387_v38 = vpop.f32.mrb[13].mxu0  ;;  %v451_v39 = vpop.f32.mrb[13].mxu1 }
 0x116   :  { %v388_v40 = vpop.f32.mrb[14].mxu0  ;;  %v452_v41 = vpop.f32.mrb[14].mxu1 }
 0x117   :  { %v389_v42 = vadd.f32 %v1147_v43, %v388_v40  ;;  %v453_v44 = vadd.f32 %v1147_v43, %v452_v41  ;;  %v390_v45 = vpop.f32.mrb[15].mxu0  ;;  %v454_v46 = vpop.f32.mrb[15].mxu1  ;;  %v494_v47 = vmax.f32 %v386_v36, 0.0  ;;  %v510_v48 = vmax.f32 %v450_v37, 0.0 }
 0x119   :  { %v495_v49 = vmax.f32 %v389_v42, 0.0  ;;  %v511_v50 = vmax.f32 %v453_v44, 0.0 }
 0x11b   :  { %v825_v51 = vpack.c.bf16 %v495_v49, %v494_v47  ;;  %v865_v52 = vpack.c.bf16 %v511_v50, %v510_v48 }
 0x11c   :  { %v393_v53 = vpop.f32.mrb[16].mxu0  ;;  %v457_v54 = vpop.f32.mrb[16].mxu1 }
 0x11d   :  { %889 = vst [vmem:[%s1232_s3 + $0x18] sm:$0xff] %v825_v51   ;;  %897 = vst [vmem:[%s1232_s3 + $0x58] sm:$0xff] %v865_v52   ;;  %v394_v55 = vadd.f32 %v1147_v43, %v393_v53  ;;  %v458_v56 = vadd.f32 %v1147_v43, %v457_v54  ;;  %v395_v57 = vpop.f32.mrb[17].mxu0  ;;  %v459_v58 = vpop.f32.mrb[17].mxu1 }
 0x11e   :  { %v396_v59 = vpop.f32.mrb[18].mxu0  ;;  %v460_v60 = vpop.f32.mrb[18].mxu1 }
 0x11f   :  { %v397_v61 = vadd.f32 %v1147_v43, %v396_v59  ;;  %v461_v62 = vadd.f32 %v1147_v43, %v460_v60  ;;  %v398_v63 = vpop.f32.mrb[19].mxu0  ;;  %v462_v0 = vpop.f32.mrb[19].mxu1  ;;  %v496_v1 = vmax.f32 %v394_v55, 0.0  ;;  %v512_v2 = vmax.f32 %v458_v56, 0.0 }
 0x121   :  { %v497_v3 = vmax.f32 %v397_v61, 0.0  ;;  %v513_v4 = vmax.f32 %v461_v62, 0.0 }
 0x123   :  { %v830_v5 = vpack.c.bf16 %v497_v3, %v496_v1  ;;  %v870_v6 = vpack.c.bf16 %v513_v4, %v512_v2 }
 0x124   :  { %v401_v7 = vpop.f32.mrb[20].mxu0  ;;  %v465_v8 = vpop.f32.mrb[20].mxu1 }
 0x125   :  { %890 = vst [vmem:[%s1232_s3 + $0x20] sm:$0xff] %v830_v5   ;;  %898 = vst [vmem:[%s1232_s3 + $0x60] sm:$0xff] %v870_v6   ;;  %v402_v9 = vadd.f32 %v1147_v43, %v401_v7  ;;  %v466_v10 = vadd.f32 %v1147_v43, %v465_v8  ;;  %v403_v11 = vpop.f32.mrb[21].mxu0  ;;  %v467_v12 = vpop.f32.mrb[21].mxu1 }
 0x126   :  { %v404_v13 = vpop.f32.mrb[22].mxu0  ;;  %v468_v14 = vpop.f32.mrb[22].mxu1 }
 0x127   :  { %v405_v15 = vadd.f32 %v1147_v43, %v404_v13  ;;  %v469_v16 = vadd.f32 %v1147_v43, %v468_v14  ;;  %v406_v17 = vpop.f32.mrb[23].mxu0  ;;  %v470_v18 = vpop.f32.mrb[23].mxu1  ;;  %v498_v19 = vmax.f32 %v402_v9, 0.0  ;;  %v514_v20 = vmax.f32 %v466_v10, 0.0 }
 0x129   :  { %v499_v21 = vmax.f32 %v405_v15, 0.0  ;;  %v515_v22 = vmax.f32 %v469_v16, 0.0 }
 0x12b   :  { %v835_v23 = vpack.c.bf16 %v499_v21, %v498_v19  ;;  %v875_v24 = vpack.c.bf16 %v515_v22, %v514_v20 }
 0x12c   :  { %v409_v25 = vpop.f32.mrb[24].mxu0  ;;  %v473_v26 = vpop.f32.mrb[24].mxu1 }
 0x12d   :  { %891 = vst [vmem:[%s1232_s3 + $0x28] sm:$0xff] %v835_v23   ;;  %899 = vst [vmem:[%s1232_s3 + $0x68] sm:$0xff] %v875_v24   ;;  %v410_v27 = vadd.f32 %v1147_v43, %v409_v25  ;;  %v474_v28 = vadd.f32 %v1147_v43, %v473_v26  ;;  %v411_v29 = vpop.f32.mrb[25].mxu0  ;;  %v475_v30 = vpop.f32.mrb[25].mxu1 }
 0x12e   :  { %v412_v31 = vpop.f32.mrb[26].mxu0  ;;  %v476_v32 = vpop.f32.mrb[26].mxu1 }
 0x12f   :  { %v413_v33 = vadd.f32 %v1147_v43, %v412_v31  ;;  %v477_v34 = vadd.f32 %v1147_v43, %v476_v32  ;;  %v414_v35 = vpop.f32.mrb[27].mxu0  ;;  %v478_v36 = vpop.f32.mrb[27].mxu1  ;;  %v500_v37 = vmax.f32 %v410_v27, 0.0  ;;  %v516_v38 = vmax.f32 %v474_v28, 0.0 }
 0x131   :  { %v501_v39 = vmax.f32 %v413_v33, 0.0  ;;  %v517_v40 = vmax.f32 %v477_v34, 0.0 }
 0x133   :  { %v840_v41 = vpack.c.bf16 %v501_v39, %v500_v37  ;;  %v880_v42 = vpack.c.bf16 %v517_v40, %v516_v38 }
 0x134   :  { %v417_v44 = vpop.f32.mrb[28].mxu0  ;;  %v481_v45 = vpop.f32.mrb[28].mxu1 }
 0x135   :  { %892 = vst [vmem:[%s1232_s3 + $0x30] sm:$0xff] %v840_v41   ;;  %900 = vst [vmem:[%s1232_s3 + $0x70] sm:$0xff] %v880_v42   ;;  %v418_v46 = vadd.f32 %v1147_v43, %v417_v44  ;;  %v482_v47 = vadd.f32 %v1147_v43, %v481_v45  ;;  %v419_v48 = vpop.f32.mrb[29].mxu0  ;;  %v483_v49 = vpop.f32.mrb[29].mxu1 }
 0x136   :  { %v420_v50 = vpop.f32.mrb[30].mxu0  ;;  %v484_v51 = vpop.f32.mrb[30].mxu1 }
 0x137   :  { %v421_v52 = vadd.f32 %v1147_v43, %v420_v50  ;;  %v485_v53 = vadd.f32 %v1147_v43, %v484_v51  ;;  %v422_v54 = vpop.f32.mrb[31].mxu0  ;;  %v486_v55 = vpop.f32.mrb[31].mxu1  ;;  %v502_v56 = vmax.f32 %v418_v46, 0.0  ;;  %v518_v57 = vmax.f32 %v482_v47, 0.0 }
 0x139   :  { %v503_v58 = vmax.f32 %v421_v52, 0.0  ;;  %v519_v59 = vmax.f32 %v485_v53, 0.0 }
 0x13b   :  { %v845_v60 = vpack.c.bf16 %v503_v58, %v502_v56  ;;  %v885_v61 = vpack.c.bf16 %v519_v59, %v518_v57 }
 0x13d   :  { %893 = vst [vmem:[%s1232_s3 + $0x38] sm:$0xff] %v845_v60   ;;  %901 = vst [vmem:[%s1232_s3 + $0x78] sm:$0xff] %v885_v61  }

// kernel: crnn_forward.3
= control target key start
LH: loop header
LB: loop body
LE: loop exit
PB: predicated region body
PF: predicated region fallthrough
CT: control target
= control target key end

     0   :  { %v1916_v2 = vmov 0   ;;  %vm109_vm0 = vcmask 654336   ;;  %s2469_s0 = inlined_call_operand.vmem [shape: bf16[64,80], index: 0, kind: input, shape index: {}]   ;;  %s2470_s1 = inlined_call_operand.vmem [shape: bf16[80,128], index: 1, kind: input, shape index: {}]   ;;  %s2471_s2 = inlined_call_operand.vmem [shape: f32[1,128], index: 2, kind: input, shape index: {}]   ;;  %s2472_s3 = inlined_call_operand.vmem [shape: bf16[128,256], index: 3, kind: input, shape index: {}]   ;;  %s2473_s4 = inlined_call_operand.vmem [shape: f32[1,256], index: 4, kind: input, shape index: {}]   ;;  %s2474_s5 = inlined_call_operand.vmem [shape: bf16[64,256], index: 5, kind: input, shape index: {}]   ;;  %s2475_s6 = inlined_call_operand.vmem [shape: f32[1,256], index: 6, kind: input, shape index: {}]   ;;  %s2476_s7 = inlined_call_operand.vmem [shape: bf16[64,128], index: 7, kind: input, shape index: {}]   ;;  %s2477_s8 = inlined_call_operand.vmem [shape: f32[1,128], index: 8, kind: input, shape index: {}]   ;;  %s2478_s9 = inlined_call_operand.hbm [shape: f32[16,128], index: 9, kind: output, shape index: {}]  }
   0x1   :  { %v1705_v0 = vld [vmem:[%s2470_s1] sm:$0xff]   ;;  %v1706_v1 = vld [vmem:[%s2470_s1 + $0x8] sm:$0xff]   ;;  %344 = vmatprep.mubr.bf16.mxu1 %v1916_v2  ;;  %v1707_v3 = vld [vmem:[%s2470_s1 + $0x10] sm:$0xff]  }
   0x2   :  { %1645 = vmatprep.subr.bf16.mxu0 %v1705_v0  ;;  %v1710_v4 = vld [vmem:[%s2469_s0] sm:$0xff]   ;;  %v1708_v5 = vld [vmem:[%s2470_s1 + $0x18] sm:$0xff]   ;;  %v1711_v10 = vld [vmem:[%s2469_s0 + $0x8] sm:$0xff]  }
   0x3   :  { %1646 = vmatpush3.bf16.msra.mxu0 %v1705_v0  ;;  %1655 = vmatprep.mubr.msk.bf16.mxu0 %vm109_vm0, %v1710_v4  ;;  %v1709_v6 = vld [vmem:[%s2470_s1 + $0x20] sm:$0xff]   ;;  %v1729_v11 = vld [vmem:[%s2472_s3 + $0x14] ss:$8 sps:$4 sm:$0xff]   ;;  %v1731_v12 = vld [vmem:[%s2472_s3 + $0x10] ss:$8 sps:$4 sm:$0xff]  }
   0x4   :  { %1647 = vmatprep.subr.bf16.mxu0 %v1706_v1  ;;  %v1999_v7 = vld [vmem:[%s2474_s5 + $0x4] ss:$8 sps:$4 sm:$0xff]   ;;  %v1728_v9 = vld [vmem:[%s2472_s3] ss:$8 sps:$4 sm:$0xff]   ;;  %v1712_v13 = vld [vmem:[%s2469_s0 + $0x10] sm:$0xff]  }
   0x5   :  { %v1726_v8 = vld [vmem:[%s2472_s3 + $0x4] ss:$8 sps:$4 sm:$0xff]   ;;  %v2022_v14 = vld [vmem:[%s2474_s5] ss:$8 sps:$4 sm:$0xff]   ;;  %v2027_v15 = vld [vmem:[%s2474_s5 + $0x14] ss:$8 sps:$4 sm:$0xff]  }
   0x6   :  { %312 = vmatprep.subr.bf16.mxu1 %v1726_v8  ;;  %v2033_v16 = vld [vmem:[%s2474_s5 + $0x10] ss:$8 sps:$4 sm:$0xff]  }
   0x7   :  { %1648 = vmatpush3.bf16.msra.mxu0 %v1706_v1  ;;  %313 = vmatpush1.bf16.msra.mxu1 %v1728_v9 }
   0x8   :  { %1649 = vmatprep.subr.bf16.mxu0 %v1707_v3  ;;  %314 = vmatprep.subr.bf16.mxu1 %v1729_v11 }
   0xb   :  { %1650 = vmatpush3.bf16.msra.mxu0 %v1707_v3  ;;  %315 = vmatpush1.bf16.msra.mxu1 %v1731_v12 }
   0xc   :  { %1651 = vmatprep.subr.bf16.mxu0 %v1708_v5 }
   0xf   :  { %1652 = vmatpush3.bf16.msra.mxu0 %v1708_v5 }
  0x10   :  { %1653 = vmatprep.subr.bf16.mxu0 %v1709_v6 }
  0x13   :  { %1654 = vmatpush3.bf16.msra.mxu0 %v1709_v6 }
  0x14   :  { %420 = vmatprep.subr.bf16.mxu0 %v1999_v7 }
  0x16   :  { %1656 = vmatmul.mubr.msk.bf16.vlgmr.msra.gmra.mrb[0].mxu0 %vm109_vm0, %v1711_v10 }
  0x17   :  { %1659 = vmatprep.mubr.msk.bf16.mxu0 %vm109_vm0, %v1712_v13  ;;  %421 = vmatpush1.bf16.msra.mxu0 %v2022_v14 }
  0x18   :  { %14 = vsyncpa [#allocation3], 0  ;;  %422 = vmatprep.subr.bf16.mxu0 %v2027_v15  ;;  %v2042_v17 = vld [vmem:[%s2474_s5 + $0x24] ss:$8 sps:$4 sm:$0xff]   ;;  %v1713_v18 = vld [vmem:[%s2469_s0 + $0x18] sm:$0xff]   ;;  %v1917_v22 = vmov 0.0|0.0   ;;  %v222_v41 = vlaneseq }
  0x19   :  { %v2051_v19 = vld [vmem:[%s2474_s5 + $0x20] ss:$8 sps:$4 sm:$0xff]   ;;  %v2057_v20 = vld [vmem:[%s2474_s5 + $0x34] ss:$8 sps:$4 sm:$0xff]   ;;  %v2064_v21 = vld [vmem:[%s2474_s5 + $0x30] ss:$8 sps:$4 sm:$0xff]  }
  0x1a   :  { %v1732_v23 = vld [vmem:[%s2472_s3 + $0x24] ss:$8 sps:$4 sm:$0xff]   ;;  %v1734_v24 = vld [vmem:[%s2472_s3 + $0x20] ss:$8 sps:$4 sm:$0xff]   ;;  %v1735_v25 = vld [vmem:[%s2472_s3 + $0x34] ss:$8 sps:$4 sm:$0xff]  }
  0x1b   :  { %423 = vmatpush1.bf16.msra.mxu0 %v2033_v16  ;;  %316 = vmatprep.subr.bf16.mxu1 %v1732_v23  ;;  %v1737_v26 = vld [vmem:[%s2472_s3 + $0x30] ss:$8 sps:$4 sm:$0xff]   ;;  %v1738_v27 = vld [vmem:[%s2472_s3 + $0x44] ss:$8 sps:$4 sm:$0xff]   ;;  %v1740_v28 = vld [vmem:[%s2472_s3 + $0x40] ss:$8 sps:$4 sm:$0xff]  }
  0x1c   :  { %424 = vmatprep.subr.bf16.mxu0 %v2042_v17  ;;  %317 = vmatpush1.bf16.msra.mxu1 %v1734_v24  ;;  %v1741_v29 = vld [vmem:[%s2472_s3 + $0x54] ss:$8 sps:$4 sm:$0xff]   ;;  %v1743_v30 = vld [vmem:[%s2472_s3 + $0x50] ss:$8 sps:$4 sm:$0xff]   ;;  %v1744_v31 = vld [vmem:[%s2472_s3 + $0x64] ss:$8 sps:$4 sm:$0xff]  }
  0x1d   :  { %318 = vmatprep.subr.bf16.mxu1 %v1735_v25  ;;  %v1746_v32 = vld [vmem:[%s2472_s3 + $0x60] ss:$8 sps:$4 sm:$0xff]   ;;  %v1747_v33 = vld [vmem:[%s2472_s3 + $0x74] ss:$8 sps:$4 sm:$0xff]   ;;  %v1749_v34 = vld [vmem:[%s2472_s3 + $0x70] ss:$8 sps:$4 sm:$0xff]  }
  0x1e   :  { %1660 = vmatmul.mubr.msk.bf16.gmra.mrb[4].mxu0 %vm109_vm0, %v1713_v18  ;;  %v1556_v35 = vld [vmem:[%s2471_s2] ss:$0 sm:$0xff]  ;;  %v223_v50 = vshrl.u32 %v222_v41, 7  ;;  %s1920_s11 = smov 32   ;;  %vm533_vm1 = vcmask 261120   ;;  %vm416_vm2 = vcmask 523264  }
  0x1f   :  { %425 = vmatpush1.bf16.msra.mxu0 %v2051_v19  ;;  %452 = vmatprep.mubr.bf16.mxu0 %v1916_v2  ;;  %v363_v59 = vld [vmem:[%s2475_s6] sm:$0x3]  ;;  %s1918_s6 = smov 64   ;;  %vm1922_vm3 = vmmov 0   ;;  %vm1427_vm4 = vcmask 1041408   ;;  %vm1429_vm5 = vcmask 1043456  }
  0x20   :  { %426 = vmatprep.subr.bf16.mxu0 %v2057_v20  ;;  %319 = vmatpush1.bf16.msra.mxu1 %v1737_v26  ;;  %v228_v57 = vsub.s32 1, %v223_v50  ;;  %v224_v63 = vsub.s32 0, %v223_v50  ;;  %vm1431_vm6 = vcmask 1045504  }
  0x21   :  { %320 = vmatprep.subr.bf16.mxu1 %v1738_v27 }
  0x22   :  { %v2122_v4 = vrot.slane %v363_v59, %v228_v57  ;;  %v2124_v12 = vrot.slane %v363_v59, %v224_v63 }
  0x23   :  { %427 = vmatpush1.bf16.msra.mxu0 %v2064_v21 }
  0x24   :  { %665 = vmatprep.subr.bf16.mxu0 %v1999_v7  ;;  %321 = vmatpush1.bf16.msra.mxu1 %v1740_v28  ;;  %v220_v28 = vld [vmem:[%s2473_s4] sm:$0x3]  ;;  %s1919_s4 = smov 96  }
  0x25   :  { %322 = vmatprep.subr.bf16.mxu1 %v1741_v29  ;;  %v225_v29 = vrot.slane %v220_v28, %v224_v63 }
  0x26   :  { %453 = vmatmul.mubr.bf16.vlgmr.msra.gmra.mrb[8].mxu0 %v1917_v22 }
  0x27   :  { %666 = vmatpush1.bf16.msra.mxu0 %v2022_v14  ;;  %697 = vmatprep.mubr.bf16.mxu0 %v1916_v2 }
  0x28   :  { %667 = vmatprep.subr.bf16.mxu0 %v2027_v15  ;;  %323 = vmatpush1.bf16.msra.mxu1 %v1743_v30  ;;  %v229_v30 = vrot.slane %v220_v28, %v228_v57 }
  0x29   :  { %324 = vmatprep.subr.bf16.mxu1 %v1744_v31 }
  0x2b   :  { %668 = vmatpush1.bf16.msra.mxu0 %v2033_v16 }
  0x2c   :  { %669 = vmatprep.subr.bf16.mxu0 %v2042_v17  ;;  %325 = vmatpush1.bf16.msra.mxu1 %v1746_v32 }
  0x2d   :  { %326 = vmatprep.subr.bf16.mxu1 %v1747_v33 }
  0x2f   :  { %670 = vmatpush1.bf16.msra.mxu0 %v2051_v19 }
  0x30   :  { %671 = vmatprep.subr.bf16.mxu0 %v2057_v20  ;;  %327 = vmatpush1.bf16.msra.mxu1 %v1749_v34 }
  0x31   :  { %539 = vmatprep.subr.bf16.mxu1 %v1999_v7 }
  0x33   :  { %672 = vmatpush1.bf16.msra.mxu0 %v2064_v21 }
  0x34   :  { %912 = vmatprep.subr.bf16.mxu0 %v1999_v7 }
  0xe9   :  { %v1657_v36 = vpop.f32.mrb[0].mxu0 }
  0xea   :  { %v165_v37 = vadd.f32 %v1657_v36, %v1556_v35  ;;  %v156_v38 = vpop.f32.mrb[1].mxu0 }
  0xeb   :  { %v157_v39 = vadd.f32 %v1556_v35, %v156_v38  ;;  %v1658_v40 = vpop.f32.mrb[2].mxu0 }
  0xec   :  { %v189_v42 = vmax.f32 %v165_v37, 0.0  ;;  %v168_v43 = vadd.f32 %v1658_v40, %v1556_v35  ;;  %v159_v44 = vpop.f32.mrb[3].mxu0 }
  0xed   :  { %v187_v45 = vmax.f32 %v157_v39, 0.0  ;;  %v160_v46 = vadd.f32 %v1556_v35, %v159_v44 }
  0xee   :  { %v190_v47 = vmax.f32 %v168_v43, 0.0 }
  0xef   :  { %v195_v48 = vadd.f32 %v189_v42, %v187_v45  ;;  %v188_v49 = vmax.f32 %v160_v46, 0.0 }
  0xf1   :  { %v196_v51 = vadd.f32 %v190_v47, %v188_v49  ;;  %v1661_v52 = vpop.f32.mrb[4].mxu0 }
  0xf2   :  { %v172_v53 = vpop.f32.mrb[5].mxu0  ;;  %v181_v54 = vadd.f32 %v1661_v52, %v1556_v35 }
  0xf3   :  { %v173_v55 = vadd.f32 %v1556_v35, %v172_v53  ;;  %v1662_v56 = vpop.f32.mrb[6].mxu0 }
  0xf4   :  { %v175_v58 = vpop.f32.mrb[7].mxu0  ;;  %v184_v61 = vadd.f32 %v1662_v56, %v1556_v35  ;;  %v193_v0 = vmax.f32 %v181_v54, 0.0 }
  0xf5   :  { %v191_v60 = vmax.f32 %v173_v55, 0.0  ;;  %v176_v62 = vadd.f32 %v1556_v35, %v175_v58 }
  0xf6   :  { %v194_v6 = vmax.f32 %v184_v61, 0.0 }
  0xf7   :  { %v197_v1 = vadd.f32 %v195_v48, %v191_v60  ;;  %v192_v3 = vmax.f32 %v176_v62, 0.0 }
  0xf9   :  { %v199_v5 = vadd.f32 %v197_v1, %v193_v0  ;;  %v198_v8 = vadd.f32 %v196_v51, %v192_v3  ;;  %v454_v9 = vpop.f32.mrb[8].mxu0 }
  0xfa   :  { %v456_v10 = vpop.f32.mrb[9].mxu0  ;;  %v455_v27 = vadd.f32 %v454_v9, %v2124_v12 }
  0xfb   :  { %v200_v11 = vadd.f32 %v198_v8, %v194_v6  ;;  %v2127_v13 = vadd.f32 %v456_v10, %v2122_v4  ;;  %v458_v18 = vpop.f32.mrb[10].mxu0  ;;  %v201_v23 = vmul.f32 0.25, %v199_v5 }
  0xfc   :  { %v459_v22 = vpop.f32.mrb[11].mxu0  ;;  %v487_v36 = vrot.slane %v455_v27, 2 }
  0xfd   :  { %v202_v24 = vmul.f32 0.25, %v200_v11  ;;  %v497_v25 = vrot.slane %v2127_v13, 2 }
  0xff   :  { %v203_v26 = vpack.c.bf16 %v202_v24, %v201_v23  ;;  %506 = vrot.lane.b32.xlu0 %v497_v25, %s1918_s6 }
 0x101   :  { %345 = vmatmul.mubr.bf16.vlgmr.msra.gmra.mrb[0].mxu1 %v203_v26 }
 0x102   :  { %540 = vmatpush1.bf16.msra.mxu1 %v2022_v14  ;;  %571 = vmatprep.mubr.bf16.mxu1 %v1916_v2 }
 0x103   :  { %469 = vrot.lane.b32.xlu0 %v455_v27, %s1918_s6  ;;  %541 = vmatprep.subr.bf16.mxu1 %v2027_v15 }
 0x106   :  { %542 = vmatpush1.bf16.msra.mxu1 %v2033_v16 }
 0x107   :  { %543 = vmatprep.subr.bf16.mxu1 %v2042_v17 }
 0x10a   :  { %544 = vmatpush1.bf16.msra.mxu1 %v2051_v19 }
 0x10b   :  { %545 = vmatprep.subr.bf16.mxu1 %v2057_v20 }
 0x10e   :  { %546 = vmatpush1.bf16.msra.mxu1 %v2064_v21 }
 0x10f   :  { %790 = vmatprep.subr.bf16.mxu1 %v1999_v7 }
 0x171   :  { %v507_v47 = vpop.permute.xlu0 %506 }
 0x175   :  { %v470_v51 = vpop.permute.xlu0 %469 }
 0x1d4   :  { %v346_v31 = vpop.f32.mrb[0].mxu1 }
 0x1d5   :  { %v2145_v32 = vadd.f32 %v346_v31, %v225_v29  ;;  %v348_v33 = vpop.f32.mrb[1].mxu1 }
 0x1d6   :  { %v2147_v34 = vadd.f32 %v348_v33, %v229_v30  ;;  %v350_v35 = vpop.f32.mrb[2].mxu1 }
 0x1d7   :  { %v2149_v37 = vadd.f32 %v350_v35, %v225_v29  ;;  %v352_v38 = vpop.f32.mrb[3].mxu1  ;;  %v461_v39 = vadd.f32 %v455_v27, %v2145_v32 }
 0x1d8   :  { %v2155_v53 = vadd.f32 %v352_v38, %v229_v30 }
 0x1d9   :  { %v489_v40 = vadd.f32 %v487_v36, %v2149_v37  ;;  %v1594_v41 = vmul.f32 -1.442695, %v461_v39 }
 0x1da   :  { %v499_v60 = vadd.f32 %v497_v25, %v2155_v53 }
 0x1db   :  { %v1595_v42 = vmul.f32 -1.442695, %v489_v40  ;;  %1754 = vpow2.f32 %v1594_v41 }
 0x1dc   :  { %v1596_v61 = vmul.f32 -1.442695, %v499_v60 }
 0x1dd   :  { %1756 = vpow2.f32 %v1595_v42 }
 0x1e5   :  { %v1755_v43 = vpop.eup %1754 }
 0x1e6   :  { %v465_v46 = vadd.f32 1.0, %v1755_v43 }
 0x1e7   :  { %v1757_v44 = vpop.eup %1756 }
 0x1e8   :  { %v493_v45 = vadd.f32 1.0, %v1757_v44 }
 0x1ea   :  { %1758 = vrcp.f32 %v493_v45 }
 0x1eb   :  { %1760 = vrcp.f32 %v465_v46 }
 0x1f4   :  { %v1759_v48 = vpop.eup %1758 }
 0x1f5   :  { %v509_v49 = vmul.f32 %v1759_v48, %v507_v47  ;;  %v1761_v50 = vpop.eup %1760 }
 0x1f6   :  { %v472_v52 = vmul.f32 %v1761_v50, %v470_v51  ;;  %v479_v9 = vsub.f32 1.0, %v1761_v50  ;;  %v485_v11 = vmul.f32 0.0, %v1761_v50 }
 0x1f7   :  { %511 = vrot.lane.b32.xlu1 %v509_v49, %s1918_s6 }
 0x1fb   :  { %474 = vrot.lane.b32.xlu1 %v472_v52, %s1918_s6 }
 0x269   :  { %v512_v54 = vpop.permute.xlu1 %511 }
 0x26a   :  { %v514_v55 = vadd.f32 %v512_v54, %v2155_v53 }
 0x26c   :  { %1762 = vtanh.f32 %v514_v55 }
 0x26d   :  { %v475_v56 = vpop.permute.xlu1 %474 }
 0x26e   :  { %v477_v57 = vadd.f32 %v475_v56, %v2145_v32 }
 0x270   :  { %1764 = vtanh.f32 %v477_v57 }
 0x271   :  { %1766 = vpow2.f32 %v1596_v61 }
 0x276   :  { %v1763_v58 = vpop.eup %1762 }
 0x277   :  { %518 = vrot.lane.b32.xlu0 %v1763_v58, %s1919_s4 }
 0x27a   :  { %v1765_v59 = vpop.eup %1764 }
 0x27b   :  { %481 = vrot.lane.b32.xlu1 %v1765_v59, %s1919_s4  ;;  %v1767_v62 = vpop.eup %1766 }
 0x27c   :  { %v503_v63 = vadd.f32 1.0, %v1767_v62 }
 0x27e   :  { %1768 = vrcp.f32 %v503_v63 }
 0x288   :  { %v1769_v0 = vpop.eup %1768 }
 0x289   :  { %v516_v1 = vsub.f32 1.0, %v1769_v0  ;;  %v522_v5 = vmul.f32 0.0, %v1769_v0 }
 0x2e9   :  { %v519_v3 = vpop.permute.xlu0 %518 }
 0x2ea   :  { %v521_v6 = vmul.f32 %v519_v3, %v516_v1 }
 0x2ec   :  { %v2162_v8 = vadd.f32 %v522_v5, %v521_v6 }
 0x2ed   :  { %v482_v10 = vpop.permute.xlu1 %481 }
 0x2ee   :  { %v484_v13 = vmul.f32 %v482_v10, %v479_v9  ;;  %v529_v18 = vrot.slane %v2162_v8, 6  ;;  %v645_v9 = vrot.slane %v2162_v8, 2 }
 0x2f0   :  { %v2165_v22 = vadd.f32 %v485_v11, %v484_v13  ;;  %530 = vrot.lane.b32.xlu1 %v529_v18, %s1920_s11 }
 0x2f2   :  { %525 = vrot.lane.b32.xlu0 %v2165_v22, %s1919_s4  ;;  %v606_v1 = vrot.slane %v2165_v22, 6 }
 0x362   :  { %v531_v23 = vpop.permute.xlu1 %530 }
 0x364   :  { %v2170_v24 = vpop.permute.xlu0 %525 }
 0x365   :  { %v534_v25 = vsel %vm533_vm1, %v2170_v24, %v531_v23 }
 0x366   :  { %v535_v26 = vpack.c.bf16 %v534_v25, %v534_v25 }
 0x368   :  { %1597 = vmatmul.mubr.msk.bf16.vlgmr.msra.gmra.mrb[4].mxu1 %vm416_vm2, %v535_v26 }
 0x369   :  { %791 = vmatpush1.bf16.msra.mxu1 %v2022_v14  ;;  %822 = vmatprep.mubr.bf16.mxu1 %v1916_v2 }
 0x36a   :  { %792 = vmatprep.subr.bf16.mxu1 %v2027_v15 }
 0x36d   :  { %793 = vmatpush1.bf16.msra.mxu1 %v2033_v16 }
 0x36e   :  { %794 = vmatprep.subr.bf16.mxu1 %v2042_v17 }
 0x371   :  { %795 = vmatpush1.bf16.msra.mxu1 %v2051_v19 }
 0x372   :  { %796 = vmatprep.subr.bf16.mxu1 %v2057_v20 }
 0x375   :  { %797 = vmatpush1.bf16.msra.mxu1 %v2064_v21 }
 0x376   :  { %1033 = vmatprep.subr.bf16.mxu1 %v1999_v7 }
 0x43b   :  { %v573_v27 = vpop.f32.mrb[4].mxu1 }
 0x43c   :  { %v574_v28 = vadd.f32 %v573_v27, %v2124_v12  ;;  %v575_v29 = vpop.f32.mrb[5].mxu1 }
 0x43d   :  { %v576_v30 = vadd.f32 %v575_v29, %v2122_v4  ;;  %v577_v31 = vpop.f32.mrb[6].mxu1 }
 0x43e   :  { %v581_v33 = vrot.slane %v574_v28, 6  ;;  %v578_v35 = vpop.f32.mrb[7].mxu1  ;;  %v610_v38 = vrot.slane %v574_v28, 4 }
 0x43f   :  { %v620_v36 = vrot.slane %v576_v30, 4 }
 0x440   :  { %590 = vrot.lane.b32.xlu1 %v581_v33, %s1918_s6  ;;  %v583_v39 = vadd.f32 %v581_v33, %v2145_v32  ;;  %v612_v40 = vadd.f32 %v610_v38, %v2149_v37 }
 0x441   :  { %629 = vrot.lane.b32.xlu0 %v620_v36, %s1918_s6  ;;  %v622_v60 = vadd.f32 %v620_v36, %v2155_v53 }
 0x442   :  { %v1598_v41 = vmul.f32 -1.442695, %v583_v39  ;;  %v1599_v42 = vmul.f32 -1.442695, %v612_v40 }
 0x443   :  { %v1600_v61 = vmul.f32 -1.442695, %v622_v60 }
 0x444   :  { %1770 = vpow2.f32 %v1598_v41 }
 0x445   :  { %1772 = vpow2.f32 %v1599_v42 }
 0x44e   :  { %v1771_v43 = vpop.eup %1770 }
 0x44f   :  { %v1773_v44 = vpop.eup %1772  ;;  %v587_v45 = vadd.f32 1.0, %v1771_v43 }
 0x450   :  { %v616_v46 = vadd.f32 1.0, %v1773_v44 }
 0x451   :  { %1774 = vrcp.f32 %v587_v45 }
 0x452   :  { %1776 = vrcp.f32 %v616_v46 }
 0x45b   :  { %v1775_v47 = vpop.eup %1774 }
 0x45c   :  { %v1777_v49 = vpop.eup %1776  ;;  %v600_v3 = vsub.f32 1.0, %v1775_v47  ;;  %v608_v10 = vmul.f32 %v1775_v47, %v606_v1 }
 0x4b2   :  { %v591_v48 = vpop.permute.xlu1 %590 }
 0x4b3   :  { %v593_v50 = vmul.f32 %v1775_v47, %v591_v48  ;;  %v630_v51 = vpop.permute.xlu0 %629 }
 0x4b4   :  { %v632_v52 = vmul.f32 %v1777_v49, %v630_v51 }
 0x4b5   :  { %595 = vrot.lane.b32.xlu1 %v593_v50, %s1918_s6 }
 0x4b6   :  { %634 = vrot.lane.b32.xlu0 %v632_v52, %s1918_s6 }
 0x527   :  { %v596_v54 = vpop.permute.xlu1 %595 }
 0x528   :  { %v598_v55 = vadd.f32 %v596_v54, %v2145_v32  ;;  %v635_v56 = vpop.permute.xlu0 %634 }
 0x529   :  { %v637_v57 = vadd.f32 %v635_v56, %v2155_v53 }
 0x52a   :  { %1778 = vtanh.f32 %v598_v55 }
 0x52b   :  { %1780 = vtanh.f32 %v637_v57 }
 0x52c   :  { %1782 = vpow2.f32 %v1600_v61 }
 0x534   :  { %v1779_v58 = vpop.eup %1778 }
 0x535   :  { %v1781_v59 = vpop.eup %1780  ;;  %602 = vrot.lane.b32.xlu1 %v1779_v58, %s1919_s4 }
 0x536   :  { %641 = vrot.lane.b32.xlu0 %v1781_v59, %s1919_s4  ;;  %v1783_v62 = vpop.eup %1782 }
 0x537   :  { %v626_v63 = vadd.f32 1.0, %v1783_v62 }
 0x539   :  { %1784 = vrcp.f32 %v626_v63 }
 0x543   :  { %v1785_v0 = vpop.eup %1784 }
 0x544   :  { %v639_v6 = vsub.f32 1.0, %v1785_v0  ;;  %v647_v18 = vmul.f32 %v1785_v0, %v645_v9 }
 0x5a7   :  { %v603_v5 = vpop.permute.xlu1 %602 }
 0x5a8   :  { %v605_v11 = vmul.f32 %v603_v5, %v600_v3  ;;  %v642_v13 = vpop.permute.xlu0 %641 }
 0x5a9   :  { %v644_v23 = vmul.f32 %v642_v13, %v639_v6 }
 0x5aa   :  { %v2199_v25 = vadd.f32 %v608_v10, %v605_v11 }
 0x5ab   :  { %v2201_v26 = vadd.f32 %v647_v18, %v644_v23 }
 0x5ac   :  { %650 = vrot.lane.b32.xlu0 %v2199_v25, %s1919_s4  ;;  %v732_v10 = vrot.slane %v2199_v25, 6 }
 0x5ad   :  { %v654_v27 = vrot.slane %v2201_v26, 2 }
 0x5af   :  { %655 = vrot.lane.b32.xlu1 %v654_v27, %s1920_s11 }
 0x61e   :  { %v2209_v22 = vpop.permute.xlu0 %650 }
 0x621   :  { %v656_v28 = vpop.permute.xlu1 %655 }
 0x622   :  { %v658_v29 = vsel %vm533_vm1, %v2209_v22, %v656_v28 }
 0x623   :  { %v659_v30 = vpack.c.bf16 %v658_v29, %v658_v29 }
 0x625   :  { %v661_v31 = vrot.slane %v659_v30, 1 }
 0x627   :  { %1601 = vmatmul.mubr.msk.bf16.vlgmr.msra.gmra.mrb[12].mxu0 %vm416_vm2, %v661_v31 }
 0x628   :  { %913 = vmatpush1.bf16.msra.mxu0 %v2022_v14  ;;  %944 = vmatprep.mubr.bf16.mxu0 %v1916_v2 }
 0x629   :  { %914 = vmatprep.subr.bf16.mxu0 %v2027_v15 }
 0x62c   :  { %915 = vmatpush1.bf16.msra.mxu0 %v2033_v16 }
 0x62d   :  { %916 = vmatprep.subr.bf16.mxu0 %v2042_v17 }
 0x630   :  { %917 = vmatpush1.bf16.msra.mxu0 %v2051_v19 }
 0x631   :  { %918 = vmatprep.subr.bf16.mxu0 %v2057_v20 }
 0x634   :  { %919 = vmatpush1.bf16.msra.mxu0 %v2064_v21 }
 0x635   :  { %1159 = vmatprep.subr.bf16.mxu0 %v1999_v7 }
 0x6fa   :  { %v699_v33 = vpop.f32.mrb[12].mxu0 }
 0x6fb   :  { %v700_v35 = vadd.f32 %v699_v33, %v2124_v12  ;;  %v701_v36 = vpop.f32.mrb[13].mxu0 }
 0x6fc   :  { %v702_v38 = vadd.f32 %v701_v36, %v2122_v4  ;;  %v703_v39 = vpop.f32.mrb[14].mxu0 }
 0x6fd   :  { %v707_v40 = vrot.slane %v700_v35, 4  ;;  %v704_v41 = vpop.f32.mrb[15].mxu0  ;;  %v736_v43 = vrot.slane %v700_v35, 6 }
 0x6fe   :  { %v746_v42 = vrot.slane %v702_v38, 6 }
 0x6ff   :  { %716 = vrot.lane.b32.xlu1 %v707_v40, %s1918_s6  ;;  %v709_v44 = vadd.f32 %v707_v40, %v2145_v32  ;;  %v738_v45 = vadd.f32 %v736_v43, %v2149_v37 }
 0x700   :  { %755 = vrot.lane.b32.xlu0 %v746_v42, %s1918_s6  ;;  %v748_v1 = vadd.f32 %v746_v42, %v2155_v53 }
 0x701   :  { %v1602_v46 = vmul.f32 -1.442695, %v709_v44  ;;  %v1603_v47 = vmul.f32 -1.442695, %v738_v45 }
 0x702   :  { %v1604_v3 = vmul.f32 -1.442695, %v748_v1 }
 0x703   :  { %1786 = vpow2.f32 %v1602_v46 }
 0x704   :  { %1788 = vpow2.f32 %v1603_v47 }
 0x70d   :  { %v1787_v48 = vpop.eup %1786 }
 0x70e   :  { %v1789_v49 = vpop.eup %1788  ;;  %v713_v50 = vadd.f32 1.0, %v1787_v48 }
 0x70f   :  { %v742_v51 = vadd.f32 1.0, %v1789_v49 }
 0x710   :  { %1790 = vrcp.f32 %v713_v50 }
 0x711   :  { %1792 = vrcp.f32 %v742_v51 }
 0x71a   :  { %v1791_v52 = vpop.eup %1790 }
 0x71b   :  { %v1793_v55 = vpop.eup %1792  ;;  %v726_v11 = vsub.f32 1.0, %v1791_v52  ;;  %v734_v23 = vmul.f32 %v1791_v52, %v732_v10 }
 0x771   :  { %v717_v54 = vpop.permute.xlu1 %716 }
 0x772   :  { %v719_v56 = vmul.f32 %v1791_v52, %v717_v54  ;;  %v756_v57 = vpop.permute.xlu0 %755 }
 0x773   :  { %v758_v58 = vmul.f32 %v1793_v55, %v756_v57 }
 0x774   :  { %721 = vrot.lane.b32.xlu1 %v719_v56, %s1918_s6 }
 0x775   :  { %760 = vrot.lane.b32.xlu0 %v758_v58, %s1918_s6 }
 0x7e6   :  { %v722_v59 = vpop.permute.xlu1 %721 }
 0x7e7   :  { %v724_v60 = vadd.f32 %v722_v59, %v2145_v32  ;;  %v761_v61 = vpop.permute.xlu0 %760 }
 0x7e8   :  { %v763_v62 = vadd.f32 %v761_v61, %v2155_v53 }
 0x7e9   :  { %1794 = vtanh.f32 %v724_v60 }
 0x7ea   :  { %1796 = vtanh.f32 %v763_v62 }
 0x7eb   :  { %1798 = vpow2.f32 %v1604_v3 }
 0x7f3   :  { %v1795_v63 = vpop.eup %1794 }
 0x7f4   :  { %v1797_v0 = vpop.eup %1796  ;;  %728 = vrot.lane.b32.xlu1 %v1795_v63, %s1919_s4 }
 0x7f5   :  { %767 = vrot.lane.b32.xlu0 %v1797_v0, %s1919_s4  ;;  %v1799_v5 = vpop.eup %1798 }
 0x7f6   :  { %v752_v6 = vadd.f32 1.0, %v1799_v5 }
 0x7f8   :  { %1800 = vrcp.f32 %v752_v6 }
 0x802   :  { %v1801_v9 = vpop.eup %1800 }
 0x803   :  { %v765_v18 = vsub.f32 1.0, %v1801_v9  ;;  %v772_v30 = vmul.f32 %v1801_v9, %v654_v27 }
 0x866   :  { %v729_v13 = vpop.permute.xlu1 %728 }
 0x867   :  { %v731_v28 = vmul.f32 %v729_v13, %v726_v11  ;;  %v768_v29 = vpop.permute.xlu0 %767 }
 0x868   :  { %v770_v31 = vmul.f32 %v768_v29, %v765_v18 }
 0x869   :  { %v2239_v33 = vadd.f32 %v734_v23, %v731_v28 }
 0x86a   :  { %v2241_v35 = vadd.f32 %v772_v30, %v770_v31 }
 0x86b   :  { %775 = vrot.lane.b32.xlu0 %v2239_v33, %s1919_s4  ;;  %v857_v28 = vrot.slane %v2239_v33, 6 }
 0x86c   :  { %v779_v36 = vrot.slane %v2241_v35, 6  ;;  %v892_v23 = vrot.slane %v2241_v35, 2 }
 0x86e   :  { %780 = vrot.lane.b32.xlu1 %v779_v36, %s1920_s11 }
 0x8dd   :  { %v2247_v25 = vpop.permute.xlu0 %775 }
 0x8e0   :  { %v781_v38 = vpop.permute.xlu1 %780 }
 0x8e1   :  { %v783_v39 = vsel %vm533_vm1, %v2247_v25, %v781_v38 }
 0x8e2   :  { %v784_v40 = vpack.c.bf16 %v783_v39, %v783_v39 }
 0x8e4   :  { %v786_v27 = vrot.slane %v784_v40, 2 }
 0x8e6   :  { %1605 = vmatmul.mubr.msk.bf16.vlgmr.msra.gmra.mrb[8].mxu1 %vm416_vm2, %v786_v27 }
 0x8e7   :  { %1034 = vmatpush1.bf16.msra.mxu1 %v2022_v14  ;;  %1065 = vmatprep.mubr.bf16.mxu1 %v1916_v2 }
 0x8e8   :  { %1035 = vmatprep.subr.bf16.mxu1 %v2027_v15 }
 0x8eb   :  { %1036 = vmatpush1.bf16.msra.mxu1 %v2033_v16 }
 0x8ec   :  { %1037 = vmatprep.subr.bf16.mxu1 %v2042_v17 }
 0x8ef   :  { %1038 = vmatpush1.bf16.msra.mxu1 %v2051_v19 }
 0x8f0   :  { %1039 = vmatprep.subr.bf16.mxu1 %v2057_v20 }
 0x8f3   :  { %1040 = vmatpush1.bf16.msra.mxu1 %v2064_v21 }
 0x8f4   :  { %1284 = vmatprep.subr.bf16.mxu1 %v1999_v7 }
 0x9b9   :  { %v824_v41 = vpop.f32.mrb[8].mxu1 }
 0x9ba   :  { %v825_v42 = vadd.f32 %v824_v41, %v2124_v12  ;;  %v826_v43 = vpop.f32.mrb[9].mxu1 }
 0x9bb   :  { %v827_v44 = vadd.f32 %v826_v43, %v2122_v4  ;;  %v828_v45 = vpop.f32.mrb[10].mxu1 }
 0x9bc   :  { %v832_v46 = vrot.slane %v825_v42, 2  ;;  %v829_v47 = vpop.f32.mrb[11].mxu1  ;;  %v861_v48 = vadd.f32 %v825_v42, %v2149_v37 }
 0x9bd   :  { %876 = vrot.lane.b32.xlu0 %v827_v44, %s1918_s6  ;;  %v868_v6 = vadd.f32 %v827_v44, %v2155_v53 }
 0x9be   :  { %841 = vrot.lane.b32.xlu1 %v832_v46, %s1918_s6  ;;  %v834_v49 = vadd.f32 %v832_v46, %v2145_v32  ;;  %v1607_v50 = vmul.f32 -1.442695, %v861_v48 }
 0x9bf   :  { %v1608_v9 = vmul.f32 -1.442695, %v868_v6 }
 0x9c0   :  { %v1606_v51 = vmul.f32 -1.442695, %v834_v49  ;;  %1802 = vpow2.f32 %v1607_v50 }
 0x9c2   :  { %1804 = vpow2.f32 %v1606_v51 }
 0x9ca   :  { %v1803_v7 = vpop.eup %1802 }
 0x9cb   :  { %v865_v54 = vadd.f32 1.0, %v1803_v7 }
 0x9cc   :  { %v1805_v52 = vpop.eup %1804 }
 0x9cd   :  { %v838_v55 = vadd.f32 1.0, %v1805_v52  ;;  %1806 = vrcp.f32 %v865_v54 }
 0x9cf   :  { %1808 = vrcp.f32 %v838_v55 }
 0x9d7   :  { %v1807_v56 = vpop.eup %1806 }
 0x9d9   :  { %v1809_v58 = vpop.eup %1808 }
 0x9da   :  { %v851_v30 = vsub.f32 1.0, %v1809_v58  ;;  %v859_v39 = vmul.f32 %v1809_v58, %v857_v28 }
 0xa2f   :  { %v877_v57 = vpop.permute.xlu0 %876 }
 0xa30   :  { %v879_v59 = vmul.f32 %v1807_v56, %v877_v57  ;;  %v842_v60 = vpop.permute.xlu1 %841 }
 0xa31   :  { %v844_v61 = vmul.f32 %v1809_v58, %v842_v60 }
 0xa32   :  { %881 = vrot.lane.b32.xlu0 %v879_v59, %s1918_s6 }
 0xa33   :  { %846 = vrot.lane.b32.xlu1 %v844_v61, %s1918_s6 }
 0xaa4   :  { %v882_v62 = vpop.permute.xlu0 %881 }
 0xaa5   :  { %v884_v63 = vadd.f32 %v882_v62, %v2155_v53  ;;  %v847_v0 = vpop.permute.xlu1 %846 }
 0xaa6   :  { %v849_v1 = vadd.f32 %v847_v0, %v2145_v32 }
 0xaa7   :  { %1810 = vtanh.f32 %v884_v63 }
 0xaa8   :  { %1812 = vtanh.f32 %v849_v1 }
 0xaa9   :  { %1814 = vpow2.f32 %v1608_v9 }
 0xab1   :  { %v1811_v3 = vpop.eup %1810 }
 0xab2   :  { %v1813_v5 = vpop.eup %1812  ;;  %888 = vrot.lane.b32.xlu0 %v1811_v3, %s1919_s4 }
 0xab3   :  { %853 = vrot.lane.b32.xlu1 %v1813_v5, %s1919_s4  ;;  %v1815_v10 = vpop.eup %1814 }
 0xab4   :  { %v872_v11 = vadd.f32 1.0, %v1815_v10 }
 0xab6   :  { %1816 = vrcp.f32 %v872_v11 }
 0xac0   :  { %v1817_v13 = vpop.eup %1816 }
 0xac1   :  { %v886_v18 = vsub.f32 1.0, %v1817_v13  ;;  %v894_v31 = vmul.f32 %v1817_v13, %v892_v23 }
 0xb24   :  { %v889_v29 = vpop.permute.xlu0 %888 }
 0xb25   :  { %v891_v36 = vmul.f32 %v889_v29, %v886_v18  ;;  %v854_v38 = vpop.permute.xlu1 %853 }
 0xb26   :  { %v856_v40 = vmul.f32 %v854_v38, %v851_v30 }
 0xb27   :  { %v2276_v27 = vadd.f32 %v894_v31, %v891_v36 }
 0xb28   :  { %v2278_v53 = vadd.f32 %v859_v39, %v856_v40 }
 0xb29   :  { %v901_v41 = vrot.slane %v2276_v27, 2 }
 0xb2a   :  { %897 = vrot.lane.b32.xlu0 %v2278_v53, %s1919_s4  ;;  %v977_v30 = vrot.slane %v2278_v53, 6 }
 0xb2b   :  { %902 = vrot.lane.b32.xlu1 %v901_v41, %s1920_s11 }
 0xb9c   :  { %v2286_v33 = vpop.permute.xlu0 %897 }
 0xb9d   :  { %v903_v42 = vpop.permute.xlu1 %902 }
 0xb9e   :  { %v905_v43 = vsel %vm533_vm1, %v2286_v33, %v903_v42 }
 0xb9f   :  { %v906_v44 = vpack.c.bf16 %v905_v43, %v905_v43 }
 0xba1   :  { %v908_v45 = vrot.slane %v906_v44, 3 }
 0xba3   :  { %1609 = vmatmul.mubr.msk.bf16.vlgmr.msra.gmra.mrb[16].mxu0 %vm416_vm2, %v908_v45 }
 0xba4   :  { %1160 = vmatpush1.bf16.msra.mxu0 %v2022_v14  ;;  %1191 = vmatprep.mubr.bf16.mxu0 %v1916_v2 }
 0xba5   :  { %1161 = vmatprep.subr.bf16.mxu0 %v2027_v15 }
 0xba8   :  { %1162 = vmatpush1.bf16.msra.mxu0 %v2033_v16 }
 0xba9   :  { %1163 = vmatprep.subr.bf16.mxu0 %v2042_v17 }
 0xbac   :  { %1164 = vmatpush1.bf16.msra.mxu0 %v2051_v19 }
 0xbad   :  { %1165 = vmatprep.subr.bf16.mxu0 %v2057_v20 }
 0xbb0   :  { %1166 = vmatpush1.bf16.msra.mxu0 %v2064_v21 }
 0xc76   :  { %v946_v46 = vpop.f32.mrb[16].mxu0 }
 0xc77   :  { %v947_v47 = vadd.f32 %v946_v46, %v2124_v12  ;;  %v948_v48 = vpop.f32.mrb[17].mxu0 }
 0xc78   :  { %v949_v14 = vadd.f32 %v948_v48, %v2122_v4  ;;  %v950_v49 = vpop.f32.mrb[18].mxu0 }
 0xc79   :  { %v951_v50 = vpop.f32.mrb[19].mxu0  ;;  %961 = vrot.lane.b32.xlu1 %v947_v47, %s1918_s6  ;;  %v981_v51 = vrot.slane %v947_v47, 2  ;;  %v953_v7 = vadd.f32 %v947_v47, %v2149_v37 }
 0xc7a   :  { %v991_v15 = vrot.slane %v949_v14, 2  ;;  %v1891_v50 = vld [vmem:[%s2474_s5 + $0x14] ss:$8 sps:$4 sm:$0xff]  }
 0xc7b   :  { %v983_v52 = vadd.f32 %v981_v51, %v2145_v32  ;;  %v1610_v54 = vmul.f32 -1.442695, %v953_v7 }
 0xc7c   :  { %1000 = vrot.lane.b32.xlu0 %v991_v15, %s1918_s6  ;;  %v993_v13 = vadd.f32 %v991_v15, %v2147_v34 }
 0xc7d   :  { %v1611_v55 = vmul.f32 -1.442695, %v983_v52  ;;  %1818 = vpow2.f32 %v1610_v54 }
 0xc7e   :  { %v1612_v18 = vmul.f32 -1.442695, %v993_v13 }
 0xc7f   :  { %1820 = vpow2.f32 %v1611_v55 }
 0xc87   :  { %v1819_v56 = vpop.eup %1818 }
 0xc88   :  { %v957_v58 = vadd.f32 1.0, %v1819_v56 }
 0xc89   :  { %v1821_v57 = vpop.eup %1820 }
 0xc8a   :  { %v987_v59 = vadd.f32 1.0, %v1821_v57  ;;  %1822 = vrcp.f32 %v957_v58 }
 0xc8c   :  { %1824 = vrcp.f32 %v987_v59 }
 0xc94   :  { %v1823_v60 = vpop.eup %1822 }
 0xc95   :  { %v971_v31 = vsub.f32 1.0, %v1823_v60  ;;  %v979_v38 = vmul.f32 %v1823_v60, %v977_v30 }
 0xc96   :  { %v1825_v63 = vpop.eup %1824 }
 0xceb   :  { %v962_v61 = vpop.permute.xlu1 %961 }
 0xcec   :  { %v964_v62 = vmul.f32 %v1823_v60, %v962_v61 }
 0xcee   :  { %v1001_v0 = vpop.permute.xlu0 %1000  ;;  %966 = vrot.lane.b32.xlu1 %v964_v62, %s1918_s6 }
 0xcef   :  { %v1003_v1 = vmul.f32 %v1825_v63, %v1001_v0 }
 0xcf1   :  { %1005 = vrot.lane.b32.xlu0 %v1003_v1, %s1918_s6 }
 0xd60   :  { %v967_v3 = vpop.permute.xlu1 %966 }
 0xd61   :  { %v969_v5 = vadd.f32 %v967_v3, %v2149_v37 }
 0xd63   :  { %1826 = vtanh.f32 %v969_v5  ;;  %v1006_v6 = vpop.permute.xlu0 %1005 }
 0xd64   :  { %v1008_v9 = vadd.f32 %v1006_v6, %v2147_v34 }
 0xd66   :  { %1828 = vtanh.f32 %v1008_v9 }
 0xd67   :  { %1830 = vpow2.f32 %v1612_v18 }
 0xd6d   :  { %v1827_v10 = vpop.eup %1826 }
 0xd6e   :  { %973 = vrot.lane.b32.xlu1 %v1827_v10, %s1919_s4 }
 0xd70   :  { %v1829_v11 = vpop.eup %1828 }
 0xd71   :  { %1012 = vrot.lane.b32.xlu0 %v1829_v11, %s1919_s4  ;;  %v1831_v23 = vpop.eup %1830 }
 0xd72   :  { %v997_v28 = vadd.f32 1.0, %v1831_v23 }
 0xd74   :  { %1832 = vrcp.f32 %v997_v28 }
 0xd7e   :  { %v1833_v29 = vpop.eup %1832 }
 0xd7f   :  { %v1010_v40 = vsub.f32 1.0, %v1833_v29  ;;  %v1017_v44 = vmul.f32 %v1833_v29, %v901_v41  ;;  %v1890_v41 = vld [vmem:[%s2474_s5] ss:$8 sps:$4 sm:$0xff]  }
 0xde0   :  { %v974_v36 = vpop.permute.xlu1 %973 }
 0xde1   :  { %v976_v39 = vmul.f32 %v974_v36, %v971_v31 }
 0xde3   :  { %v2313_v42 = vadd.f32 %v979_v38, %v976_v39  ;;  %v1013_v43 = vpop.permute.xlu0 %1012 }
 0xde4   :  { %v1015_v45 = vmul.f32 %v1013_v43, %v1010_v40 }
 0xde5   :  { %1020 = vrot.lane.b32.xlu0 %v2313_v42, %s1919_s4  ;;  %v1100_v38 = vrot.slane %v2313_v42, 6 }
 0xde6   :  { %v2319_v46 = vadd.f32 %v1017_v44, %v1015_v45 }
 0xde8   :  { %v1024_v47 = vrot.slane %v2319_v46, 6 }
 0xdea   :  { %1025 = vrot.lane.b32.xlu1 %v1024_v47, %s1920_s11 }
 0xe57   :  { %v2323_v53 = vpop.permute.xlu0 %1020 }
 0xe5c   :  { %v1026_v48 = vpop.permute.xlu1 %1025 }
 0xe5d   :  { %v1028_v14 = vsel %vm533_vm1, %v2323_v53, %v1026_v48 }
 0xe5e   :  { %v1029_v49 = vpack.c.bf16 %v1028_v14, %v1028_v14 }
 0xe60   :  { %1613 = vmatmul.mubr.msk.bf16.vlgmr.msra.gmra.mrb[12].mxu1 %vm416_vm2, %v1029_v49 }
 0xe61   :  { %1285 = vmatpush1.bf16.msra.mxu1 %v1890_v41  ;;  %1316 = vmatprep.mubr.bf16.mxu1 %v1916_v2 }
 0xe62   :  { %1286 = vmatprep.subr.bf16.mxu1 %v1891_v50 }
 0xe65   :  { %1287 = vmatpush1.bf16.msra.mxu1 %v2033_v16 }
 0xe66   :  { %1288 = vmatprep.subr.bf16.mxu1 %v2042_v17 }
 0xe69   :  { %1289 = vmatpush1.bf16.msra.mxu1 %v2051_v19 }
 0xe6a   :  { %1290 = vmatprep.subr.bf16.mxu1 %v2057_v20 }
 0xe6d   :  { %1291 = vmatpush1.bf16.msra.mxu1 %v2064_v21  ;;  %v1139_v21 = vrot.slane %v2319_v46, 2 }
 0xf33   :  { %v1067_v15 = vpop.f32.mrb[12].mxu1 }
 0xf34   :  { %v1068_v51 = vadd.f32 %v1067_v15, %v2124_v12  ;;  %v1069_v7 = vpop.f32.mrb[13].mxu1 }
 0xf35   :  { %v1070_v2 = vadd.f32 %v1069_v7, %v2122_v4  ;;  %v1071_v52 = vpop.f32.mrb[14].mxu1 }
 0xf36   :  { %v1075_v54 = vrot.slane %v1068_v51, 6  ;;  %v1072_v55 = vpop.f32.mrb[15].mxu1  ;;  %v1104_v59 = vrot.slane %v1068_v51, 4 }
 0xf37   :  { %v1114_v56 = vrot.slane %v1070_v2, 4 }
 0xf38   :  { %1084 = vrot.lane.b32.xlu1 %v1075_v54, %s1918_s6  ;;  %v1077_v60 = vadd.f32 %v1075_v54, %v2149_v37  ;;  %v1106_v61 = vadd.f32 %v1104_v59, %v2145_v32 }
 0xf39   :  { %v1116_v16 = vadd.f32 %v1114_v56, %v2147_v34  ;;  %1123 = vrot.lane.b32.xlu0 %v1114_v56, %s1918_s6 }
 0xf3a   :  { %v1614_v62 = vmul.f32 -1.442695, %v1077_v60  ;;  %v1615_v63 = vmul.f32 -1.442695, %v1106_v61 }
 0xf3b   :  { %v1616_v17 = vmul.f32 -1.442695, %v1116_v16 }
 0xf3d   :  { %1834 = vpow2.f32 %v1616_v17 }
 0xf47   :  { %v1835_v19 = vpop.eup %1834 }
 0xf48   :  { %v1120_v20 = vadd.f32 1.0, %v1835_v19 }
 0xf4a   :  { %1836 = vrcp.f32 %v1120_v20 }
 0xf4b   :  { %1838 = vpow2.f32 %v1614_v62 }
 0xf4c   :  { %1840 = vpow2.f32 %v1615_v63 }
 0xf54   :  { %v1837_v57 = vpop.eup %1836 }
 0xf55   :  { %v1141_v58 = vmul.f32 %v1837_v57, %v1139_v21  ;;  %v1839_v0 = vpop.eup %1838  ;;  %v1133_v43 = vsub.f32 1.0, %v1837_v57 }
 0xf56   :  { %v1841_v1 = vpop.eup %1840  ;;  %v1081_v3 = vadd.f32 1.0, %v1839_v0 }
 0xf57   :  { %v1110_v5 = vadd.f32 1.0, %v1841_v1 }
 0xf58   :  { %1842 = vrcp.f32 %v1081_v3 }
 0xf59   :  { %1844 = vrcp.f32 %v1110_v5 }
 0xf62   :  { %v1843_v6 = vpop.eup %1842 }
 0xf63   :  { %v1845_v10 = vpop.eup %1844  ;;  %v1094_v39 = vsub.f32 1.0, %v1843_v6  ;;  %v1102_v44 = vmul.f32 %v1843_v6, %v1100_v38 }
 0xfaa   :  { %v1085_v9 = vpop.permute.xlu1 %1084 }
 0xfab   :  { %v1087_v11 = vmul.f32 %v1843_v6, %v1085_v9  ;;  %v1124_v13 = vpop.permute.xlu0 %1123 }
 0xfac   :  { %v1126_v18 = vmul.f32 %v1845_v10, %v1124_v13 }
 0xfad   :  { %1089 = vrot.lane.b32.xlu1 %v1087_v11, %s1918_s6 }
 0xfae   :  { %1128 = vrot.lane.b32.xlu0 %v1126_v18, %s1918_s6 }
0x101f   :  { %v1090_v23 = vpop.permute.xlu1 %1089 }
0x1020   :  { %v1092_v28 = vadd.f32 %v1090_v23, %v2149_v37  ;;  %v1129_v29 = vpop.permute.xlu0 %1128 }
0x1021   :  { %v1131_v30 = vadd.f32 %v1129_v29, %v2147_v34 }
0x1022   :  { %1846 = vtanh.f32 %v1092_v28 }
0x1023   :  { %1848 = vtanh.f32 %v1131_v30 }
0x102c   :  { %v1847_v31 = vpop.eup %1846 }
0x102d   :  { %v1849_v36 = vpop.eup %1848  ;;  %1096 = vrot.lane.b32.xlu1 %v1847_v31, %s1919_s4 }
0x102e   :  { %1135 = vrot.lane.b32.xlu0 %v1849_v36, %s1919_s4 }
0x109f   :  { %v1097_v40 = vpop.permute.xlu1 %1096 }
0x10a0   :  { %v1099_v45 = vmul.f32 %v1097_v40, %v1094_v39  ;;  %v1136_v47 = vpop.permute.xlu0 %1135 }
0x10a1   :  { %v1138_v48 = vmul.f32 %v1136_v47, %v1133_v43 }
0x10a2   :  { %v2355_v14 = vadd.f32 %v1102_v44, %v1099_v45 }
0x10a3   :  { %v2357_v49 = vadd.f32 %v1141_v58, %v1138_v48 }
0x10a4   :  { %1144 = vrot.lane.b32.xlu0 %v2355_v14, %s1919_s4  ;;  %v1226_v39 = vrot.slane %v2355_v14, 6 }
0x10a5   :  { %v1148_v41 = vrot.slane %v2357_v49, 2 }
0x10a7   :  { %1149 = vrot.lane.b32.xlu1 %v1148_v41, %s1920_s11 }
0x1116   :  { %v2365_v42 = vpop.permute.xlu0 %1144 }
0x1119   :  { %v1150_v50 = vpop.permute.xlu1 %1149 }
0x111a   :  { %v1152_v15 = vsel %vm533_vm1, %v2365_v42, %v1150_v50 }
0x111b   :  { %v1153_v51 = vpack.c.bf16 %v1152_v15, %v1152_v15 }
0x111d   :  { %v1155_v7 = vrot.slane %v1153_v51, 1 }
0x111f   :  { %1617 = vmatmul.mubr.msk.bf16.vlgmr.msra.gmra.mrb[20].mxu0 %vm416_vm2, %v1155_v7 }
0x11f2   :  { %v1193_v2 = vpop.f32.mrb[20].mxu0 }
0x11f3   :  { %v1194_v52 = vadd.f32 %v1193_v2, %v2124_v12  ;;  %v1195_v54 = vpop.f32.mrb[21].mxu0 }
0x11f4   :  { %v1196_v55 = vadd.f32 %v1195_v54, %v2122_v4  ;;  %v1197_v56 = vpop.f32.mrb[22].mxu0 }
0x11f5   :  { %v1201_v16 = vrot.slane %v1194_v52, 4  ;;  %v1198_v17 = vpop.f32.mrb[23].mxu0  ;;  %v1230_v20 = vrot.slane %v1194_v52, 6 }
0x11f6   :  { %v1240_v19 = vrot.slane %v1196_v55, 6 }
0x11f7   :  { %1210 = vrot.lane.b32.xlu1 %v1201_v16, %s1918_s6  ;;  %v1203_v21 = vadd.f32 %v1201_v16, %v2149_v37  ;;  %v1232_v57 = vadd.f32 %v1230_v20, %v2145_v32 }
0x11f8   :  { %1249 = vrot.lane.b32.xlu0 %v1240_v19, %s1918_s6  ;;  %v1242_v29 = vadd.f32 %v1240_v19, %v2147_v34 }
0x11f9   :  { %v1618_v58 = vmul.f32 -1.442695, %v1203_v21  ;;  %v1619_v59 = vmul.f32 -1.442695, %v1232_v57 }
0x11fa   :  { %v1620_v30 = vmul.f32 -1.442695, %v1242_v29 }
0x11fb   :  { %1850 = vpow2.f32 %v1618_v58 }
0x11fc   :  { %1852 = vpow2.f32 %v1619_v59 }
0x1205   :  { %v1851_v60 = vpop.eup %1850 }
0x1206   :  { %v1853_v61 = vpop.eup %1852  ;;  %v1207_v62 = vadd.f32 1.0, %v1851_v60 }
0x1207   :  { %v1236_v63 = vadd.f32 1.0, %v1853_v61 }
0x1208   :  { %1854 = vrcp.f32 %v1207_v62 }
0x1209   :  { %1856 = vrcp.f32 %v1236_v63 }
0x1212   :  { %v1855_v0 = vpop.eup %1854 }
0x1213   :  { %v1857_v3 = vpop.eup %1856  ;;  %v1220_v40 = vsub.f32 1.0, %v1855_v0  ;;  %v1228_v45 = vmul.f32 %v1855_v0, %v1226_v39 }
0x1269   :  { %v1211_v1 = vpop.permute.xlu1 %1210 }
0x126a   :  { %v1213_v5 = vmul.f32 %v1855_v0, %v1211_v1  ;;  %v1250_v6 = vpop.permute.xlu0 %1249 }
0x126b   :  { %v1252_v9 = vmul.f32 %v1857_v3, %v1250_v6 }
0x126c   :  { %1215 = vrot.lane.b32.xlu1 %v1213_v5, %s1918_s6 }
0x126d   :  { %1254 = vrot.lane.b32.xlu0 %v1252_v9, %s1918_s6 }
0x12de   :  { %v1216_v10 = vpop.permute.xlu1 %1215 }
0x12df   :  { %v1218_v11 = vadd.f32 %v1216_v10, %v2149_v37  ;;  %v1255_v13 = vpop.permute.xlu0 %1254 }
0x12e0   :  { %v1257_v18 = vadd.f32 %v1255_v13, %v2147_v34 }
0x12e1   :  { %1858 = vtanh.f32 %v1218_v11 }
0x12e2   :  { %1860 = vtanh.f32 %v1257_v18  ;;  %v1750_v18 = vld [vmem:[%s2476_s7] sm:$0xff]  }
0x12e3   :  { %1862 = vpow2.f32 %v1620_v30  ;;  %v1751_v30 = vld [vmem:[%s2476_s7 + $0x8] sm:$0xff]  }
0x12eb   :  { %v1859_v23 = vpop.eup %1858 }
0x12ec   :  { %v1861_v28 = vpop.eup %1860  ;;  %1222 = vrot.lane.b32.xlu1 %v1859_v23, %s1919_s4 }
0x12ed   :  { %1261 = vrot.lane.b32.xlu0 %v1861_v28, %s1919_s4  ;;  %v1863_v31 = vpop.eup %1862  ;;  %v1921_v28 = vmov 0.0  }
0x12ee   :  { %v1246_v36 = vadd.f32 1.0, %v1863_v31  ;;  %1663 = vmatprep.subr.bf16.mxu0 %v1921_v28  ;;  %v1685_v31 = vpack.i.bf16 %v2241_v35, %v2276_v27  ;;  %v1752_v35 = vld [vmem:[%s2476_s7 + $0x10] sm:$0xff]   ;;  %1671 = vmatprep.mubr.msk.bf16.mxu0 %vm1922_vm3, %v1921_v28 }
0x12ef   :  { %1664 = vmatpush3.bf16.msra.mxu0 %v1750_v18 }
0x12f0   :  { %1864 = vrcp.f32 %v1246_v36  ;;  %1665 = vmatprep.subr.bf16.mxu0 %v1921_v28  ;;  %v1695_v36 = vpack.i.bf16 %v2162_v8, %v2319_v46  ;;  %v1753_v8 = vld [vmem:[%s2476_s7 + $0x18] sm:$0xff]  }
0x12f3   :  { %1666 = vmatpush3.bf16.msra.mxu0 %v1751_v30 }
0x12f4   :  { %1667 = vmatprep.subr.bf16.mxu0 %v1921_v28 }
0x12f7   :  { %1668 = vmatpush3.bf16.msra.mxu0 %v1752_v35 }
0x12f8   :  { %1669 = vmatprep.subr.bf16.mxu0 %v1921_v28 }
0x12fa   :  { %v1865_v38 = vpop.eup %1864 }
0x12fb   :  { %v1259_v44 = vsub.f32 1.0, %v1865_v38  ;;  %v1266_v50 = vmul.f32 %v1865_v38, %v1148_v41  ;;  %1670 = vmatpush3.bf16.msra.mxu0 %v1753_v8 }
0x135e   :  { %v1223_v43 = vpop.permute.xlu1 %1222 }
0x135f   :  { %v1225_v47 = vmul.f32 %v1223_v43, %v1220_v40  ;;  %v1262_v48 = vpop.permute.xlu0 %1261 }
0x1360   :  { %v1264_v15 = vmul.f32 %v1262_v48, %v1259_v44 }
0x1361   :  { %v2386_v51 = vadd.f32 %v1228_v45, %v1225_v47 }
0x1362   :  { %v2388_v7 = vadd.f32 %v1266_v50, %v1264_v15 }
0x1363   :  { %1269 = vrot.lane.b32.xlu0 %v2386_v51, %s1919_s4  ;;  %v1351_v50 = vrot.slane %v2386_v51, 6 }
0x1364   :  { %v1273_v2 = vrot.slane %v2388_v7, 6 }
0x1366   :  { %1274 = vrot.lane.b32.xlu1 %v1273_v2, %s1920_s11 }
0x13d5   :  { %v2394_v14 = vpop.permute.xlu0 %1269 }
0x13d8   :  { %v1275_v52 = vpop.permute.xlu1 %1274 }
0x13d9   :  { %v1277_v54 = vsel %vm533_vm1, %v2394_v14, %v1275_v52 }
0x13da   :  { %v1278_v55 = vpack.c.bf16 %v1277_v54, %v1277_v54 }
0x13dc   :  { %v1280_v41 = vrot.slane %v1278_v55, 2 }
0x13de   :  { %1621 = vmatmul.mubr.msk.bf16.vlgmr.msra.gmra.mrb[16].mxu1 %vm416_vm2, %v1280_v41 }
0x14b1   :  { %v1318_v56 = vpop.f32.mrb[16].mxu1 }
0x14b2   :  { %v1319_v16 = vadd.f32 %v1318_v56, %v2124_v12  ;;  %v1320_v17 = vpop.f32.mrb[17].mxu1 }
0x14b3   :  { %v1321_v19 = vadd.f32 %v1320_v17, %v2122_v4  ;;  %v1322_v20 = vpop.f32.mrb[18].mxu1 }
0x14b4   :  { %v1326_v21 = vrot.slane %v1319_v16, 2  ;;  %v1323_v57 = vpop.f32.mrb[19].mxu1  ;;  %v1355_v58 = vadd.f32 %v1319_v16, %v2145_v32 }
0x14b5   :  { %1370 = vrot.lane.b32.xlu0 %v1321_v19, %s1918_s6  ;;  %v1362_v38 = vadd.f32 %v1321_v19, %v2147_v34 }
0x14b6   :  { %1335 = vrot.lane.b32.xlu1 %v1326_v21, %s1918_s6  ;;  %v1328_v59 = vadd.f32 %v1326_v21, %v2149_v37  ;;  %v1623_v60 = vmul.f32 -1.442695, %v1355_v58 }
0x14b7   :  { %v1624_v39 = vmul.f32 -1.442695, %v1362_v38 }
0x14b8   :  { %v1622_v61 = vmul.f32 -1.442695, %v1328_v59  ;;  %1866 = vpow2.f32 %v1623_v60 }
0x14ba   :  { %1868 = vpow2.f32 %v1622_v61 }
0x14c2   :  { %v1867_v62 = vpop.eup %1866 }
0x14c3   :  { %v1359_v63 = vadd.f32 1.0, %v1867_v62 }
0x14c4   :  { %v1869_v12 = vpop.eup %1868 }
0x14c5   :  { %v1332_v0 = vadd.f32 1.0, %v1869_v12  ;;  %1870 = vrcp.f32 %v1359_v63 }
0x14c7   :  { %1872 = vrcp.f32 %v1332_v0 }
0x14cf   :  { %v1871_v4 = vpop.eup %1870 }
0x14d1   :  { %v1873_v3 = vpop.eup %1872 }
0x14d2   :  { %v1345_v48 = vsub.f32 1.0, %v1873_v3  ;;  %v1353_v52 = vmul.f32 %v1873_v3, %v1351_v50 }
0x1527   :  { %v1371_v1 = vpop.permute.xlu0 %1370 }
0x1528   :  { %v1373_v5 = vmul.f32 %v1871_v4, %v1371_v1  ;;  %v1336_v6 = vpop.permute.xlu1 %1335 }
0x1529   :  { %v1338_v9 = vmul.f32 %v1873_v3, %v1336_v6 }
0x152a   :  { %1375 = vrot.lane.b32.xlu0 %v1373_v5, %s1918_s6 }
0x152b   :  { %1340 = vrot.lane.b32.xlu1 %v1338_v9, %s1918_s6 }
0x159c   :  { %v1376_v32 = vpop.permute.xlu0 %1375 }
0x159d   :  { %v1378_v10 = vadd.f32 %v1376_v32, %v2147_v34  ;;  %v1341_v11 = vpop.permute.xlu1 %1340 }
0x159e   :  { %v1343_v13 = vadd.f32 %v1341_v11, %v2149_v37  ;;  %v1690_v37 = vpack.i.bf16 %v2201_v26, %v2357_v49  ;;  %v1386_v49 = vrot.slane %v2388_v7, 2 }
0x159f   :  { %1874 = vtanh.f32 %v1378_v10 }
0x15a0   :  { %1876 = vtanh.f32 %v1343_v13 }
0x15a1   :  { %1878 = vpow2.f32 %v1624_v39 }
0x15a9   :  { %v1875_v23 = vpop.eup %1874 }
0x15aa   :  { %v1877_v29 = vpop.eup %1876  ;;  %1382 = vrot.lane.b32.xlu0 %v1875_v23, %s1919_s4 }
0x15ab   :  { %1347 = vrot.lane.b32.xlu1 %v1877_v29, %s1919_s4  ;;  %v1879_v40 = vpop.eup %1878 }
0x15ac   :  { %v1366_v26 = vadd.f32 1.0, %v1879_v40 }
0x15ae   :  { %1691 = vrot.lane.b32.xlu0 %v1690_v37, %s1920_s11  ;;  %1880 = vrcp.f32 %v1366_v26 }
0x15af   :  { %1686 = vrot.lane.b32.xlu1 %v1685_v31, %s1920_s11 }
0x15b3   :  { %1696 = vrot.lane.b32.xlu1 %v1695_v36, %s1920_s11 }
0x15b8   :  { %v1881_v27 = vpop.eup %1880 }
0x15b9   :  { %v1380_v46 = vsub.f32 1.0, %v1881_v27  ;;  %v1388_v43 = vmul.f32 %v1881_v27, %v1386_v49 }
0x161c   :  { %v1383_v34 = vpop.permute.xlu0 %1382 }
0x161d   :  { %v1385_v44 = vmul.f32 %v1383_v34, %v1380_v46  ;;  %v1348_v45 = vpop.permute.xlu1 %1347 }
0x161e   :  { %v1350_v15 = vmul.f32 %v1348_v45, %v1345_v48 }
0x161f   :  { %v1389_v47 = vadd.f32 %v1388_v43, %v1385_v44 }
0x1620   :  { %v1354_v54 = vadd.f32 %v1353_v52, %v1350_v15  ;;  %v1692_v16 = vpop.permute.xlu0 %1691 }
0x1621   :  { %v1700_v2 = vpack.i.bf16 %v2388_v7, %v1389_v47  ;;  %v1687_v55 = vpop.permute.xlu1 %1686  ;;  %v1694_v20 = vunpack.i.h.bf16 %v1692_v16  ;;  %v1693_v7 = vunpack.i.l.bf16 %v1692_v16 }
0x1622   :  { %v1689_v41 = vunpack.i.h.bf16 %v1687_v55  ;;  %v1688_v56 = vunpack.i.l.bf16 %v1687_v55 }
0x1623   :  { %1701 = vrot.lane.b32.xlu0 %v1700_v2, %s1920_s11 }
0x1624   :  { %v1414_v19 = vsel %vm533_vm1, %v2365_v42, %v1689_v41  ;;  %v1410_v51 = vsel %vm533_vm1, %v2323_v53, %v1688_v56  ;;  %v1418_v53 = vsel %vm533_vm1, %v2394_v14, %v1694_v20  ;;  %v1402_v42 = vsel %vm533_vm1, %v2247_v25, %v1693_v7 }
0x1625   :  { %v1697_v17 = vpop.permute.xlu1 %1696  ;;  %v1433_v60 = vsel %vm1427_vm4, %v1410_v51, %v1414_v19 }
0x1626   :  { %v1698_v57 = vunpack.i.l.bf16 %v1697_v17  ;;  %v1699_v61 = vunpack.i.h.bf16 %v1697_v17  ;;  %v1434_v5 = vsel %vm1429_vm5, %v1433_v60, %v1418_v53 }
0x1627   :  { %1420 = vrot.lane.b32.xlu0 %v1354_v54, %s1919_s4 }
0x1628   :  { %v1406_v4 = vsel %vm533_vm1, %v2286_v33, %v1698_v57 }
0x1695   :  { %v1702_v21 = vpop.permute.xlu0 %1701 }
0x1696   :  { %v1704_v58 = vunpack.i.h.bf16 %v1702_v21  ;;  %v1703_v59 = vunpack.i.l.bf16 %v1702_v21 }
0x1698   :  { %v1398_v62 = vsel %vm533_vm1, %v2209_v22, %v1704_v58  ;;  %v1394_v12 = vsel %vm533_vm1, %v2170_v24, %v1703_v59  ;;  %v1625_v24 = vld [vmem:[%s2477_s8] ss:$0 sm:$0xff]  ;;  %s1923_s8 = smov [#allocation2]  }
0x1699   :  { %v1428_v63 = vsel %vm1427_vm4, %v1394_v12, %v1398_v62  ;;  %v1421_v0 = vpop.permute.xlu0 %1420  ;;  %s1545_s24 = sshll.u32 %s1923_s8, 4  ;;  %s1546_s24 = int_to_ptr.vmem [resolvable:$true] %s1545_s24 }
0x169a   :  { %v1430_v1 = vsel %vm1429_vm5, %v1428_v63, %v1402_v42  ;;  %v1426_v3 = vsel %vm533_vm1, %v1421_v0, %v1699_v61  ;;  %s1892_s25 = scalar_lea.vmem %s1546_s24, 256  ;;  %p1897_p1 = scmp.lt.s32.totalorder %s1546_s24, %s1546_s24 }
0x169b   :  { %v1432_v22 = vsel %vm1431_vm6, %v1430_v1, %v1406_v4  ;;  %v1435_v6 = vsel %vm1431_vm6, %v1434_v5, %v1426_v3  ;;  %p1893_p0 = scmp.ne.s32.totalorder %s1546_s24, %s1892_s25  ;;  %p1898_p2 = scmp.lt.s32.totalorder %s1892_s25, %s1892_s25 }
0x169c   :  { %v1436_v9 = vpack.c.bf16 %v1435_v6, %v1432_v22 }
0x169d   :  { %p1899_p3 = por %p1898_p2, %p1897_p1 }
0x169e   :  { %1672 = vmatmul.mubr.msk.bf16.vlgmr.msra.gmra.mrb[24].mxu0 %vm416_vm2, %v1436_v9 }
0x169f   :  { %p1900_p4 = pnand %p1899_p3, %p1893_p0 }
0x1771   :  { %v1513_v14 = vpop.f32.mrb[24].mxu0 }
0x1772   :  { %v1514_v25 = vadd.f32 %v1625_v24, %v1513_v14  ;;  %v1673_v32 = vpop.f32.mrb[25].mxu0 }
0x1773   :  { %v1516_v10 = vpop.f32.mrb[26].mxu0 }
0x1774   :  { %v1517_v11 = vadd.f32 %v1625_v24, %v1516_v10  ;;  %1520 = vmax.xlane.f32.xlu1 %v1514_v25  ;;  %v1674_v33 = vpop.f32.mrb[27].mxu0 }
0x1776   :  { %1522 = vmax.xlane.f32.xlu0 %v1517_v11 }
0x1801   :  { %v1521_v13 = vpop.xlane.xlu1 %1520 }
0x1802   :  { %v1524_v18 = vsub.f32 %v1514_v25, %v1521_v13 }
0x1803   :  { %v1523_v23 = vpop.xlane.xlu0 %1522 }
0x1804   :  { %v1526_v28 = vmul.f32 1.442695, %v1524_v18  ;;  %v1525_v29 = vsub.f32 %v1517_v11, %v1523_v23 }
0x1806   :  { %1882 = vpow2.f32 %v1526_v28  ;;  %v1528_v30 = vmul.f32 1.442695, %v1525_v29 }
0x1808   :  { %1884 = vpow2.f32 %v1528_v30 }
0x1810   :  { %v1883_v37 = vpop.eup %1882 }
0x1811   :  { %1530 = vadd.xlane.f32.xlu0 %v1883_v37 }
0x1812   :  { %v1885_v31 = vpop.eup %1884 }
0x1813   :  { %1532 = vadd.xlane.f32.xlu1 %v1885_v31 }
0x189e   :  { %v1531_v36 = vpop.xlane.xlu0 %1530 }
0x189f   :  { %1886 = vrcp.f32 %v1531_v36 }
0x18a0   :  { %v1533_v38 = vpop.xlane.xlu1 %1532 }
0x18a1   :  { %1888 = vrcp.f32 %v1533_v38 }
0x18a9   :  { %v1887_v39 = vpop.eup %1886 }
0x18aa   :  { %v1536_v40 = vmul.f32 %v1887_v39, %v1883_v37 }
0x18ab   :  { %v1889_v26 = vpop.eup %1888 }
0x18ac   :  { %v1537_v35 = vmul.f32 %v1889_v26, %v1885_v31  ;;  %1538 = vst [vmem:[#allocation2] sm:$0xff] %v1536_v40 }
0x18ae   :  { %1539 = vst [vmem:[#allocation2 + $0x8] sm:$0xff] %v1537_v35 }
0x18af   :  { %1903 = shalt.err (!%p1900_p4)
}
0x18b0   :  { %s1904_s0 = scalar_lea.hbm %s2478_s9, 256 }
0x18b1   :  { %p1905_p5 = scmp.ne.s32.totalorder %s2478_s9, %s1904_s0  ;;  %p1908_p6 = scmp.lt.u32.totalorder %s1904_s0, %s2478_s9 }
0x18b3   :  { %p1910_p7 = pnand %p1908_p6, %p1905_p5 }
0x18b5   :  { %1913 = shalt.err (!%p1910_p7)
}
0x18b6   :  { %s1924_s3 = smov 128   ;;  %s1925_s6 = smov 8  }
0x18b7   :  { %1551 = dma.vmem_to_hbm [thread:$0]  %s1546_s24, 256, %s2478_s9, [#allocation3], %s1924_s3, %s1924_s3, %s1925_s6  }
0x18b8   :  { %1914 = dma.done.wait [#allocation3], 256  }
0x18b9   :  { %1915 = vsyncadd [#allocation3], 4294967040 }
0x18ba   :  { %1555 = vsyncpa [#allocation3], 1 }

</bundles_post_ra>
